<compile_context>
chip_gen: v5e
topology: v5e:2x2
jax: 0.10.0
libtpu: 0.0.40
codegen_flags: <defaults>
</compile_context>

<pallas_src>
import functools

import jax
import jax.numpy as jnp
from jax.experimental import pallas as pl
from jax.experimental.pallas import tpu as pltpu


def _round_up(x, m):
    return ((x + m - 1) // m) * m


# ----------------------------------------------------------------------------
# Pallas kernel: tiled  out = act(x @ w + b)  with K-reduction accumulator
# ----------------------------------------------------------------------------
def _matmul_bias_act_kernel(x_ref, w_ref, b_ref, o_ref, acc_ref, *, apply_relu):
    @pl.when(pl.program_id(2) == 0)
    def _init():
        acc_ref[...] = jnp.zeros_like(acc_ref)

    # bf16 x bf16 -> f32 accumulate on the MXU.
    acc_ref[...] += jnp.dot(x_ref[...], w_ref[...],
                            preferred_element_type=jnp.float32)

    @pl.when(pl.program_id(2) == pl.num_programs(2) - 1)
    def _finalize():
        out = acc_ref[...] + b_ref[...]          # (1, tn) broadcasts over rows
        if apply_relu:
            out = jnp.maximum(out, 0.0)
        o_ref[...] = out.astype(o_ref.dtype)


def fused_matmul_bias_act(x, w, b, *, apply_relu, out_dtype,
                          tm_max=512, tk_max=512, tn_max=512):
    """x: (M, K), w: (K, N), b: (N,) -> (M, N) in out_dtype.

    Operands are cast to bf16; accumulation/bias/ReLU are f32.  M/K/N are
    zero-padded to the chosen tile multiples (zeros do not change the result
    and padded rows/cols are sliced off).
    """
    M, K = x.shape
    K2, N = w.shape
    assert K == K2, (K, K2)
    assert b.shape == (N,), b.shape

    # ---- tile selection: last-two block dims multiple of (8,128) or full ----
    tm = min(tm_max, _round_up(M, 8))
    Mp = _round_up(M, tm)
    if K <= tk_max:
        tk, Kp = K, K
    else:
        tk = tk_max                      # multiple of 128
        Kp = _round_up(K, tk)
    if N <= 128:
        tn, Np = N, N                    # full-dim block (legal)
    else:
        tn = min(tn_max, _round_up(N, 128))
        Np = _round_up(N, tn)

    # ---- zero-pad operands to tile multiples ----
    xp = x.astype(jnp.bfloat16)
    if (Mp, Kp) != (M, K):
        xp = jnp.pad(xp, ((0, Mp - M), (0, Kp - K)))
    wp = w.astype(jnp.bfloat16)
    if (Kp, Np) != (K, N):
        wp = jnp.pad(wp, ((0, Kp - K), (0, Np - N)))
    bp = b.astype(jnp.float32).reshape(1, N)
    if Np != N:
        bp = jnp.pad(bp, ((0, 0), (0, Np - N)))

    gm, gn, gk = Mp // tm, Np // tn, Kp // tk
    kernel = functools.partial(_matmul_bias_act_kernel, apply_relu=apply_relu)

    out = pl.pallas_call(
        kernel,
        out_shape=jax.ShapeDtypeStruct((Mp, Np), out_dtype),
        grid=(gm, gn, gk),
        in_specs=[
            pl.BlockSpec((tm, tk), lambda i, j, k: (i, k)),
            pl.BlockSpec((tk, tn), lambda i, j, k: (k, j)),
            pl.BlockSpec((1, tn), lambda i, j, k: (0, j)),
        ],
        out_specs=pl.BlockSpec((tm, tn), lambda i, j, k: (i, j)),
        scratch_shapes=[pltpu.VMEM((tm, tn), jnp.float32)],
        compiler_params=pltpu.CompilerParams(
            dimension_semantics=("parallel", "parallel", "arbitrary"),
            vmem_limit_bytes=32 * 1024 * 1024,
        ),
    )(xp, wp, bp)

    if (Mp, Np) != (M, N):
        out = out[:M, :N]
    return out


# ----------------------------------------------------------------------------
# Plain-JAX glue: im2col on NHWC activations (no layout transposes)
# ----------------------------------------------------------------------------
def im2col_nhwc(x_nhwc, kh, kw, stride, pad):
    """Patches (B*OH*OW, kh*kw*C), order (kh, kw, C) with C fastest."""
    x = jnp.pad(x_nhwc, ((0, 0), (pad, pad), (pad, pad), (0, 0)))
    B, H, W, C = x.shape
    OH = (H - kh) // stride + 1
    OW = (W - kw) // stride + 1
    cols = []
    for i in range(kh):
        for j in range(kw):
            cols.append(x[:, i:i + stride * OH:stride,
                          j:j + stride * OW:stride, :])        # (B, OH, OW, C)
    patches = jnp.stack(cols, axis=3)                           # (B,OH,OW,kh*kw,C)
    patches = patches.reshape(B, OH, OW, kh * kw * C)
    return patches.reshape(B * OH * OW, kh * kw * C), OH, OW


def conv2d_relu_nhwc(x_nhwc, w_mat, b, *, kh, kw, stride, pad):
    """Conv2d + ReLU, NHWC in / NHWC out.  w_mat is (kh*kw*in_c, out_c) bf16."""
    B = x_nhwc.shape[0]
    out_c = w_mat.shape[1]
    patches, OH, OW = im2col_nhwc(x_nhwc, kh, kw, stride, pad)
    out = fused_matmul_bias_act(patches, w_mat, b,
                                apply_relu=True, out_dtype=jnp.bfloat16)
    return out.reshape(B, OH, OW, out_c)


# ----------------------------------------------------------------------------
# Parameter initialization (kaiming fan_out/relu for convs), kernel layouts
# ----------------------------------------------------------------------------
def init_params(key, num_classes=10):
    assert num_classes <= 128
    ks = jax.random.split(key, 8)

    def kaiming_fan_out(k, shape):              # shape = (O, I, KH, KW)
        fan_out = shape[0] * shape[2] * shape[3]
        std = (2.0 / fan_out) ** 0.5
        return std * jax.random.normal(k, shape, dtype=jnp.float32)

    def conv_w_mat(w_oihw):
        # OIHW -> (KH, KW, I, O) -> (KH*KW*I, O); matches im2col K ordering.
        O, I, KH, KW = w_oihw.shape
        return jnp.transpose(w_oihw, (2, 3, 1, 0)).reshape(
            KH * KW * I, O).astype(jnp.bfloat16)

    conv1_w = kaiming_fan_out(ks[0], (64, 1, 8, 8))
    conv2_w = kaiming_fan_out(ks[2], (128, 64, 6, 6))
    conv3_w = kaiming_fan_out(ks[4], (128, 128, 5, 5))

    # fc: PyTorch does Linear(view_NCHW(B,-1)).  Fold that (C,H,W) flatten
    # order into the weight rows so the NHWC conv3 output flattens directly;
    # pre-transpose to (2048, N) and pad N to 128 lanes (lane-dense store).
    fc_w = (1.0 / (2048.0 ** 0.5)) * jax.random.normal(
        ks[6], (num_classes, 2048), dtype=jnp.float32)
    fc_w_mat = fc_w.reshape(num_classes, 128, 4, 4)        # (N, C, H, W)
    fc_w_mat = jnp.transpose(fc_w_mat, (2, 3, 1, 0))       # (H, W, C, N)
    fc_w_mat = fc_w_mat.reshape(2048, num_classes)
    fc_w_mat = jnp.pad(fc_w_mat, ((0, 0), (0, 128 - num_classes)))
    fc_b = 0.01 * jax.random.normal(ks[7], (num_classes,), dtype=jnp.float32)
    fc_b = jnp.pad(fc_b, (0, 128 - num_classes))

    return {
        "conv1_w_mat": conv_w_mat(conv1_w),
        "conv1_b": 0.01 * jax.random.normal(ks[1], (64,), dtype=jnp.float32),
        "conv2_w_mat": conv_w_mat(conv2_w),
        "conv2_b": 0.01 * jax.random.normal(ks[3], (128,), dtype=jnp.float32),
        "conv3_w_mat": conv_w_mat(conv3_w),
        "conv3_b": 0.01 * jax.random.normal(ks[5], (128,), dtype=jnp.float32),
        "fc_w_mat": fc_w_mat.astype(jnp.bfloat16),
        "fc_b": fc_b,
        # self.it parameter: unused in forward (loss_function only), kept for parity.
        "it": jnp.array([-4.6, -4.6, -4.6], dtype=jnp.float32),
    }


# ----------------------------------------------------------------------------
# Forward pass (mirrors SNNLModel.forward)
# ----------------------------------------------------------------------------
@functools.partial(jax.jit, static_argnames=("num_classes",))
def snnl_forward(params, x_nchw, *, num_classes=10):
    # single layout change; activations stay NHWC bf16 for the whole net
    x = jnp.transpose(x_nchw, (0, 2, 3, 1)).astype(jnp.bfloat16)
    # conv1: 1 -> 64,  k=8, s=2, p=3   (28x28 -> 14x14)
    h = conv2d_relu_nhwc(x, params["conv1_w_mat"], params["conv1_b"],
                         kh=8, kw=8, stride=2, pad=3)
    # conv2: 64 -> 128, k=6, s=2, p=3  (14x14 -> 8x8)
    h = conv2d_relu_nhwc(h, params["conv2_w_mat"], params["conv2_b"],
                         kh=6, kw=6, stride=2, pad=3)
    # conv3: 128 -> 128, k=5, s=1, p=0 (8x8 -> 4x4)
    h = conv2d_relu_nhwc(h, params["conv3_w_mat"], params["conv3_b"],
                         kh=5, kw=5, stride=1, pad=0)
    # NHWC flatten; the NCHW view(B,-1) permutation is folded into fc_w_mat.
    B = h.shape[0]
    h_flat = h.reshape(B, -1)                              # (B, 2048)
    logits = fused_matmul_bias_act(h_flat, params["fc_w_mat"], params["fc_b"],
                                   apply_relu=False, out_dtype=jnp.float32)
    return logits[:, :num_classes]


if __name__ == "__main__":
    key = jax.random.PRNGKey(0)
    k_param, k_x = jax.random.split(key)

    num_classes = 10
    params = init_params(k_param, num_classes=num_classes)
    # MNIST-shaped input required by fc(2048): (B, 1, 28, 28), small batch.
    x = jax.random.normal(k_x, (2, 1, 28, 28), dtype=jnp.float32)

    logits = snnl_forward(params, x, num_classes=num_classes)
    jax.block_until_ready(logits)

    assert logits.shape == (2, num_classes), logits.shape
    assert bool(jnp.all(jnp.isfinite(logits)))
    print("KERNEL_OK")
</pallas_src>

<mosaic_0001>
module attributes {stable_mosaic.version = 11 : i64} {
  func.func @_matmul_bias_act_kernel(%arg0: i32, %arg1: i32, %arg2: i32, %arg3: memref<392x64xbf16, #tpu.memory_space<vmem>>, %arg4: memref<64x64xbf16, #tpu.memory_space<vmem>>, %arg5: memref<1x64xf32, #tpu.memory_space<vmem>>, %arg6: memref<392x64xbf16, #tpu.memory_space<vmem>>, %arg7: memref<392x64xf32, #tpu.memory_space<vmem>>) attributes {dimension_semantics = [#tpu.dimension_semantics<parallel>, #tpu.dimension_semantics<parallel>, #tpu.dimension_semantics<arbitrary>], iteration_bounds = array<i64: 1, 1, 1>, scalar_prefetch = 0 : i64, scratch_operands = 1 : i64, tpu.core_type = #tpu.core_type<tc>, window_params = [{transform_indices = @transform_0, window_bounds = array<i64: 392, 64>}, {transform_indices = @transform_1, window_bounds = array<i64: 64, 64>}, {transform_indices = @transform_2, window_bounds = array<i64: 1, 64>}, {transform_indices = @transform_3, window_bounds = array<i64: 392, 64>}]} {
    %c0_i32 = arith.constant 0 : i32
    %0 = arith.cmpi eq, %arg2, %c0_i32 : i32
    %1 = arith.extui %0 : i1 to i32
    %c0_i32_0 = arith.constant 0 : i32
    %2 = arith.cmpi ne, %1, %c0_i32_0 : i32
    scf.if %2 {
      %cst_10 = arith.constant 0.000000e+00 : f32
      %12 = vector.broadcast %cst_10 : f32 to vector<392x64xf32>
      %c0_11 = arith.constant 0 : index
      %c0_12 = arith.constant 0 : index
      %13 = vector.load %arg7[%c0_11, %c0_12] : memref<392x64xf32, #tpu.memory_space<vmem>>, vector<392x64xf32>
      tpu.vector_store %arg7[%c0_11, %c0_12], %12 {strides = array<i32>} : memref<392x64xf32, #tpu.memory_space<vmem>>, vector<392x64xf32>,
    } else {
    }
    %c0 = arith.constant 0 : index
    %c0_1 = arith.constant 0 : index
    %3 = vector.load %arg7[%c0, %c0_1] : memref<392x64xf32, #tpu.memory_space<vmem>>, vector<392x64xf32>
    %c0_2 = arith.constant 0 : index
    %c0_3 = arith.constant 0 : index
    %4 = vector.load %arg3[%c0_2, %c0_3] : memref<392x64xbf16, #tpu.memory_space<vmem>>, vector<392x64xbf16>
    %c0_4 = arith.constant 0 : index
    %c0_5 = arith.constant 0 : index
    %5 = vector.load %arg4[%c0_4, %c0_5] : memref<64x64xbf16, #tpu.memory_space<vmem>>, vector<64x64xbf16>
    %cst = arith.constant dense<0.000000e+00> : vector<392x64xf32>
    %6 = tpu.matmul %4, %5, %cst {dimension_numbers = #tpu.dot_dimension_numbers<[1], [0], [0], [1], [0, 0, 1, 1], [], []>} : vector<392x64xbf16>, vector<64x64xbf16>, vector<392x64xf32> -> vector<392x64xf32>
    %7 = arith.addf %3, %6 : vector<392x64xf32>
    %c0_6 = arith.constant 0 : index
    %c0_7 = arith.constant 0 : index
    %8 = vector.load %arg7[%c0_6, %c0_7] : memref<392x64xf32, #tpu.memory_space<vmem>>, vector<392x64xf32>
    tpu.vector_store %arg7[%c0_6, %c0_7], %7 {strides = array<i32>} : memref<392x64xf32, #tpu.memory_space<vmem>>, vector<392x64xf32>,
    %c0_i32_8 = arith.constant 0 : i32
    %9 = arith.cmpi eq, %arg2, %c0_i32_8 : i32
    %10 = arith.extui %9 : i1 to i32
    %c0_i32_9 = arith.constant 0 : i32
    %11 = arith.cmpi ne, %10, %c0_i32_9 : i32
    scf.if %11 {
      %c0_10 = arith.constant 0 : index
      %c0_11 = arith.constant 0 : index
      %12 = vector.load %arg7[%c0_10, %c0_11] : memref<392x64xf32, #tpu.memory_space<vmem>>, vector<392x64xf32>
      %c0_12 = arith.constant 0 : index
      %c0_13 = arith.constant 0 : index
      %13 = vector.load %arg5[%c0_12, %c0_13] : memref<1x64xf32, #tpu.memory_space<vmem>>, vector<1x64xf32>
      %14 = vector.broadcast %13 : vector<1x64xf32> to vector<392x64xf32>
      %15 = arith.addf %12, %14 : vector<392x64xf32>
      %cst_14 = arith.constant 0.000000e+00 : f32
      %16 = vector.broadcast %cst_14 : f32 to vector<392x64xf32>
      %17 = arith.maximumf %15, %16 : vector<392x64xf32>
      %18 = arith.truncf %17 : vector<392x64xf32> to vector<392x64xbf16>
      %c0_15 = arith.constant 0 : index
      %c0_16 = arith.constant 0 : index
      %19 = vector.load %arg6[%c0_15, %c0_16] : memref<392x64xbf16, #tpu.memory_space<vmem>>, vector<392x64xbf16>
      tpu.vector_store %arg6[%c0_15, %c0_16], %18 {strides = array<i32>} : memref<392x64xbf16, #tpu.memory_space<vmem>>, vector<392x64xbf16>,
    } else {
    }
    return
  }
  func.func @transform_0(%arg0: i32, %arg1: i32, %arg2: i32) -> (i32, i32) {
    %c0_i32 = arith.constant 0 : i32
    return %arg0, %arg2 : i32, i32
  }
  func.func @transform_1(%arg0: i32, %arg1: i32, %arg2: i32) -> (i32, i32) {
    %c0_i32 = arith.constant 0 : i32
    return %arg2, %arg1 : i32, i32
  }
  func.func @transform_2(%arg0: i32, %arg1: i32, %arg2: i32) -> (i32, i32) {
    %c0_i32 = arith.constant 0 : i32
    %c0_i32_0 = arith.constant 0 : i32
    return %c0_i32, %arg1 : i32, i32
  }
  func.func @transform_3(%arg0: i32, %arg1: i32, %arg2: i32) -> (i32, i32) {
    %c0_i32 = arith.constant 0 : i32
    return %arg0, %arg1 : i32, i32
  }
}

module attributes {stable_mosaic.version = 11 : i64} {
  func.func @_matmul_bias_act_kernel(%arg0: i32, %arg1: i32, %arg2: i32, %arg3: memref<128x512xbf16, #tpu.memory_space<vmem>>, %arg4: memref<512x128xbf16, #tpu.memory_space<vmem>>, %arg5: memref<1x128xf32, #tpu.memory_space<vmem>>, %arg6: memref<128x128xbf16, #tpu.memory_space<vmem>>, %arg7: memref<128x128xf32, #tpu.memory_space<vmem>>) attributes {dimension_semantics = [#tpu.dimension_semantics<parallel>, #tpu.dimension_semantics<parallel>, #tpu.dimension_semantics<arbitrary>], iteration_bounds = array<i64: 1, 1, 5>, scalar_prefetch = 0 : i64, scratch_operands = 1 : i64, tpu.core_type = #tpu.core_type<tc>, window_params = [{transform_indices = @transform_0, window_bounds = array<i64: 128, 512>}, {transform_indices = @transform_1, window_bounds = array<i64: 512, 128>}, {transform_indices = @transform_2, window_bounds = array<i64: 1, 128>}, {transform_indices = @transform_3, window_bounds = array<i64: 128, 128>}]} {
    %c0_i32 = arith.constant 0 : i32
    %0 = arith.cmpi eq, %arg2, %c0_i32 : i32
    %1 = arith.extui %0 : i1 to i32
    %c0_i32_0 = arith.constant 0 : i32
    %2 = arith.cmpi ne, %1, %c0_i32_0 : i32
    scf.if %2 {
      %cst_9 = arith.constant 0.000000e+00 : f32
      %12 = vector.broadcast %cst_9 : f32 to vector<128x128xf32>
      %c0_10 = arith.constant 0 : index
      %c0_11 = arith.constant 0 : index
      %13 = vector.load %arg7[%c0_10, %c0_11] : memref<128x128xf32, #tpu.memory_space<vmem>>, vector<128x128xf32>
      tpu.vector_store %arg7[%c0_10, %c0_11], %12 {strides = array<i32>} : memref<128x128xf32, #tpu.memory_space<vmem>>, vector<128x128xf32>,
    } else {
    }
    %c0 = arith.constant 0 : index
    %c0_1 = arith.constant 0 : index
    %3 = vector.load %arg7[%c0, %c0_1] : memref<128x128xf32, #tpu.memory_space<vmem>>, vector<128x128xf32>
    %c0_2 = arith.constant 0 : index
    %c0_3 = arith.constant 0 : index
    %4 = vector.load %arg3[%c0_2, %c0_3] : memref<128x512xbf16, #tpu.memory_space<vmem>>, vector<128x512xbf16>
    %c0_4 = arith.constant 0 : index
    %c0_5 = arith.constant 0 : index
    %5 = vector.load %arg4[%c0_4, %c0_5] : memref<512x128xbf16, #tpu.memory_space<vmem>>, vector<512x128xbf16>
    %cst = arith.constant dense<0.000000e+00> : vector<128x128xf32>
    %6 = tpu.matmul %4, %5, %cst {dimension_numbers = #tpu.dot_dimension_numbers<[1], [0], [0], [1], [0, 0, 1, 1], [], []>} : vector<128x512xbf16>, vector<512x128xbf16>, vector<128x128xf32> -> vector<128x128xf32>
    %7 = arith.addf %3, %6 : vector<128x128xf32>
    %c0_6 = arith.constant 0 : index
    %c0_7 = arith.constant 0 : index
    %8 = vector.load %arg7[%c0_6, %c0_7] : memref<128x128xf32, #tpu.memory_space<vmem>>, vector<128x128xf32>
    tpu.vector_store %arg7[%c0_6, %c0_7], %7 {strides = array<i32>} : memref<128x128xf32, #tpu.memory_space<vmem>>, vector<128x128xf32>,
    %c4_i32 = arith.constant 4 : i32
    %9 = arith.cmpi eq, %arg2, %c4_i32 : i32
    %10 = arith.extui %9 : i1 to i32
    %c0_i32_8 = arith.constant 0 : i32
    %11 = arith.cmpi ne, %10, %c0_i32_8 : i32
    scf.if %11 {
      %c0_9 = arith.constant 0 : index
      %c0_10 = arith.constant 0 : index
      %12 = vector.load %arg7[%c0_9, %c0_10] : memref<128x128xf32, #tpu.memory_space<vmem>>, vector<128x128xf32>
      %c0_11 = arith.constant 0 : index
      %c0_12 = arith.constant 0 : index
      %13 = vector.load %arg5[%c0_11, %c0_12] : memref<1x128xf32, #tpu.memory_space<vmem>>, vector<1x128xf32>
      %14 = vector.broadcast %13 : vector<1x128xf32> to vector<128x128xf32>
      %15 = arith.addf %12, %14 : vector<128x128xf32>
      %cst_13 = arith.constant 0.000000e+00 : f32
      %16 = vector.broadcast %cst_13 : f32 to vector<128x128xf32>
      %17 = arith.maximumf %15, %16 : vector<128x128xf32>
      %18 = arith.truncf %17 : vector<128x128xf32> to vector<128x128xbf16>
      %c0_14 = arith.constant 0 : index
      %c0_15 = arith.constant 0 : index
      %19 = vector.load %arg6[%c0_14, %c0_15] : memref<128x128xbf16, #tpu.memory_space<vmem>>, vector<128x128xbf16>
      tpu.vector_store %arg6[%c0_14, %c0_15], %18 {strides = array<i32>} : memref<128x128xbf16, #tpu.memory_space<vmem>>, vector<128x128xbf16>,
    } else {
    }
    return
  }
  func.func @transform_0(%arg0: i32, %arg1: i32, %arg2: i32) -> (i32, i32) {
    %c0_i32 = arith.constant 0 : i32
    return %arg0, %arg2 : i32, i32
  }
  func.func @transform_1(%arg0: i32, %arg1: i32, %arg2: i32) -> (i32, i32) {
    %c0_i32 = arith.constant 0 : i32
    return %arg2, %arg1 : i32, i32
  }
  func.func @transform_2(%arg0: i32, %arg1: i32, %arg2: i32) -> (i32, i32) {
    %c0_i32 = arith.constant 0 : i32
    %c0_i32_0 = arith.constant 0 : i32
    return %c0_i32, %arg1 : i32, i32
  }
  func.func @transform_3(%arg0: i32, %arg1: i32, %arg2: i32) -> (i32, i32) {
    %c0_i32 = arith.constant 0 : i32
    return %arg0, %arg1 : i32, i32
  }
}

module attributes {stable_mosaic.version = 11 : i64} {
  func.func @_matmul_bias_act_kernel(%arg0: i32, %arg1: i32, %arg2: i32, %arg3: memref<32x512xbf16, #tpu.memory_space<vmem>>, %arg4: memref<512x128xbf16, #tpu.memory_space<vmem>>, %arg5: memref<1x128xf32, #tpu.memory_space<vmem>>, %arg6: memref<32x128xbf16, #tpu.memory_space<vmem>>, %arg7: memref<32x128xf32, #tpu.memory_space<vmem>>) attributes {dimension_semantics = [#tpu.dimension_semantics<parallel>, #tpu.dimension_semantics<parallel>, #tpu.dimension_semantics<arbitrary>], iteration_bounds = array<i64: 1, 1, 7>, scalar_prefetch = 0 : i64, scratch_operands = 1 : i64, tpu.core_type = #tpu.core_type<tc>, window_params = [{transform_indices = @transform_0, window_bounds = array<i64: 32, 512>}, {transform_indices = @transform_1, window_bounds = array<i64: 512, 128>}, {transform_indices = @transform_2, window_bounds = array<i64: 1, 128>}, {transform_indices = @transform_3, window_bounds = array<i64: 32, 128>}]} {
    %c0_i32 = arith.constant 0 : i32
    %0 = arith.cmpi eq, %arg2, %c0_i32 : i32
    %1 = arith.extui %0 : i1 to i32
    %c0_i32_0 = arith.constant 0 : i32
    %2 = arith.cmpi ne, %1, %c0_i32_0 : i32
    scf.if %2 {
      %cst_9 = arith.constant 0.000000e+00 : f32
      %12 = vector.broadcast %cst_9 : f32 to vector<32x128xf32>
      %c0_10 = arith.constant 0 : index
      %c0_11 = arith.constant 0 : index
      %13 = vector.load %arg7[%c0_10, %c0_11] : memref<32x128xf32, #tpu.memory_space<vmem>>, vector<32x128xf32>
      tpu.vector_store %arg7[%c0_10, %c0_11], %12 {strides = array<i32>} : memref<32x128xf32, #tpu.memory_space<vmem>>, vector<32x128xf32>,
    } else {
    }
    %c0 = arith.constant 0 : index
    %c0_1 = arith.constant 0 : index
    %3 = vector.load %arg7[%c0, %c0_1] : memref<32x128xf32, #tpu.memory_space<vmem>>, vector<32x128xf32>
    %c0_2 = arith.constant 0 : index
    %c0_3 = arith.constant 0 : index
    %4 = vector.load %arg3[%c0_2, %c0_3] : memref<32x512xbf16, #tpu.memory_space<vmem>>, vector<32x512xbf16>
    %c0_4 = arith.constant 0 : index
    %c0_5 = arith.constant 0 : index
    %5 = vector.load %arg4[%c0_4, %c0_5] : memref<512x128xbf16, #tpu.memory_space<vmem>>, vector<512x128xbf16>
    %cst = arith.constant dense<0.000000e+00> : vector<32x128xf32>
    %6 = tpu.matmul %4, %5, %cst {dimension_numbers = #tpu.dot_dimension_numbers<[1], [0], [0], [1], [0, 0, 1, 1], [], []>} : vector<32x512xbf16>, vector<512x128xbf16>, vector<32x128xf32> -> vector<32x128xf32>
    %7 = arith.addf %3, %6 : vector<32x128xf32>
    %c0_6 = arith.constant 0 : index
    %c0_7 = arith.constant 0 : index
    %8 = vector.load %arg7[%c0_6, %c0_7] : memref<32x128xf32, #tpu.memory_space<vmem>>, vector<32x128xf32>
    tpu.vector_store %arg7[%c0_6, %c0_7], %7 {strides = array<i32>} : memref<32x128xf32, #tpu.memory_space<vmem>>, vector<32x128xf32>,
    %c6_i32 = arith.constant 6 : i32
    %9 = arith.cmpi eq, %arg2, %c6_i32 : i32
    %10 = arith.extui %9 : i1 to i32
    %c0_i32_8 = arith.constant 0 : i32
    %11 = arith.cmpi ne, %10, %c0_i32_8 : i32
    scf.if %11 {
      %c0_9 = arith.constant 0 : index
      %c0_10 = arith.constant 0 : index
      %12 = vector.load %arg7[%c0_9, %c0_10] : memref<32x128xf32, #tpu.memory_space<vmem>>, vector<32x128xf32>
      %c0_11 = arith.constant 0 : index
      %c0_12 = arith.constant 0 : index
      %13 = vector.load %arg5[%c0_11, %c0_12] : memref<1x128xf32, #tpu.memory_space<vmem>>, vector<1x128xf32>
      %14 = vector.broadcast %13 : vector<1x128xf32> to vector<32x128xf32>
      %15 = arith.addf %12, %14 : vector<32x128xf32>
      %cst_13 = arith.constant 0.000000e+00 : f32
      %16 = vector.broadcast %cst_13 : f32 to vector<32x128xf32>
      %17 = arith.maximumf %15, %16 : vector<32x128xf32>
      %18 = arith.truncf %17 : vector<32x128xf32> to vector<32x128xbf16>
      %c0_14 = arith.constant 0 : index
      %c0_15 = arith.constant 0 : index
      %19 = vector.load %arg6[%c0_14, %c0_15] : memref<32x128xbf16, #tpu.memory_space<vmem>>, vector<32x128xbf16>
      tpu.vector_store %arg6[%c0_14, %c0_15], %18 {strides = array<i32>} : memref<32x128xbf16, #tpu.memory_space<vmem>>, vector<32x128xbf16>,
    } else {
    }
    return
  }
  func.func @transform_0(%arg0: i32, %arg1: i32, %arg2: i32) -> (i32, i32) {
    %c0_i32 = arith.constant 0 : i32
    return %arg0, %arg2 : i32, i32
  }
  func.func @transform_1(%arg0: i32, %arg1: i32, %arg2: i32) -> (i32, i32) {
    %c0_i32 = arith.constant 0 : i32
    return %arg2, %arg1 : i32, i32
  }
  func.func @transform_2(%arg0: i32, %arg1: i32, %arg2: i32) -> (i32, i32) {
    %c0_i32 = arith.constant 0 : i32
    %c0_i32_0 = arith.constant 0 : i32
    return %c0_i32, %arg1 : i32, i32
  }
  func.func @transform_3(%arg0: i32, %arg1: i32, %arg2: i32) -> (i32, i32) {
    %c0_i32 = arith.constant 0 : i32
    return %arg0, %arg1 : i32, i32
  }
}

module attributes {stable_mosaic.version = 11 : i64} {
  func.func @_matmul_bias_act_kernel(%arg0: i32, %arg1: i32, %arg2: i32, %arg3: memref<8x512xbf16, #tpu.memory_space<vmem>>, %arg4: memref<512x128xbf16, #tpu.memory_space<vmem>>, %arg5: memref<1x128xf32, #tpu.memory_space<vmem>>, %arg6: memref<8x128xf32, #tpu.memory_space<vmem>>, %arg7: memref<8x128xf32, #tpu.memory_space<vmem>>) attributes {dimension_semantics = [#tpu.dimension_semantics<parallel>, #tpu.dimension_semantics<parallel>, #tpu.dimension_semantics<arbitrary>], iteration_bounds = array<i64: 1, 1, 4>, scalar_prefetch = 0 : i64, scratch_operands = 1 : i64, tpu.core_type = #tpu.core_type<tc>, window_params = [{transform_indices = @transform_0, window_bounds = array<i64: 8, 512>}, {transform_indices = @transform_1, window_bounds = array<i64: 512, 128>}, {transform_indices = @transform_2, window_bounds = array<i64: 1, 128>}, {transform_indices = @transform_3, window_bounds = array<i64: 8, 128>}]} {
    %c0_i32 = arith.constant 0 : i32
    %0 = arith.cmpi eq, %arg2, %c0_i32 : i32
    %1 = arith.extui %0 : i1 to i32
    %c0_i32_0 = arith.constant 0 : i32
    %2 = arith.cmpi ne, %1, %c0_i32_0 : i32
    scf.if %2 {
      %cst_9 = arith.constant 0.000000e+00 : f32
      %12 = vector.broadcast %cst_9 : f32 to vector<8x128xf32>
      %c0_10 = arith.constant 0 : index
      %c0_11 = arith.constant 0 : index
      %13 = vector.load %arg7[%c0_10, %c0_11] : memref<8x128xf32, #tpu.memory_space<vmem>>, vector<8x128xf32>
      tpu.vector_store %arg7[%c0_10, %c0_11], %12 {strides = array<i32>} : memref<8x128xf32, #tpu.memory_space<vmem>>, vector<8x128xf32>,
    } else {
    }
    %c0 = arith.constant 0 : index
    %c0_1 = arith.constant 0 : index
    %3 = vector.load %arg7[%c0, %c0_1] : memref<8x128xf32, #tpu.memory_space<vmem>>, vector<8x128xf32>
    %c0_2 = arith.constant 0 : index
    %c0_3 = arith.constant 0 : index
    %4 = vector.load %arg3[%c0_2, %c0_3] : memref<8x512xbf16, #tpu.memory_space<vmem>>, vector<8x512xbf16>
    %c0_4 = arith.constant 0 : index
    %c0_5 = arith.constant 0 : index
    %5 = vector.load %arg4[%c0_4, %c0_5] : memref<512x128xbf16, #tpu.memory_space<vmem>>, vector<512x128xbf16>
    %cst = arith.constant dense<0.000000e+00> : vector<8x128xf32>
    %6 = tpu.matmul %4, %5, %cst {dimension_numbers = #tpu.dot_dimension_numbers<[1], [0], [0], [1], [0, 0, 1, 1], [], []>} : vector<8x512xbf16>, vector<512x128xbf16>, vector<8x128xf32> -> vector<8x128xf32>
    %7 = arith.addf %3, %6 : vector<8x128xf32>
    %c0_6 = arith.constant 0 : index
    %c0_7 = arith.constant 0 : index
    %8 = vector.load %arg7[%c0_6, %c0_7] : memref<8x128xf32, #tpu.memory_space<vmem>>, vector<8x128xf32>
    tpu.vector_store %arg7[%c0_6, %c0_7], %7 {strides = array<i32>} : memref<8x128xf32, #tpu.memory_space<vmem>>, vector<8x128xf32>,
    %c3_i32 = arith.constant 3 : i32
    %9 = arith.cmpi eq, %arg2, %c3_i32 : i32
    %10 = arith.extui %9 : i1 to i32
    %c0_i32_8 = arith.constant 0 : i32
    %11 = arith.cmpi ne, %10, %c0_i32_8 : i32
    scf.if %11 {
      %c0_9 = arith.constant 0 : index
      %c0_10 = arith.constant 0 : index
      %12 = vector.load %arg7[%c0_9, %c0_10] : memref<8x128xf32, #tpu.memory_space<vmem>>, vector<8x128xf32>
      %c0_11 = arith.constant 0 : index
      %c0_12 = arith.constant 0 : index
      %13 = vector.load %arg5[%c0_11, %c0_12] : memref<1x128xf32, #tpu.memory_space<vmem>>, vector<1x128xf32>
      %14 = vector.broadcast %13 : vector<1x128xf32> to vector<8x128xf32>
      %15 = arith.addf %12, %14 : vector<8x128xf32>
      %c0_13 = arith.constant 0 : index
      %c0_14 = arith.constant 0 : index
      %16 = vector.load %arg6[%c0_13, %c0_14] : memref<8x128xf32, #tpu.memory_space<vmem>>, vector<8x128xf32>
      tpu.vector_store %arg6[%c0_13, %c0_14], %15 {strides = array<i32>} : memref<8x128xf32, #tpu.memory_space<vmem>>, vector<8x128xf32>,
    } else {
    }
    return
  }
  func.func @transform_0(%arg0: i32, %arg1: i32, %arg2: i32) -> (i32, i32) {
    %c0_i32 = arith.constant 0 : i32
    return %arg0, %arg2 : i32, i32
  }
  func.func @transform_1(%arg0: i32, %arg1: i32, %arg2: i32) -> (i32, i32) {
    %c0_i32 = arith.constant 0 : i32
    return %arg2, %arg1 : i32, i32
  }
  func.func @transform_2(%arg0: i32, %arg1: i32, %arg2: i32) -> (i32, i32) {
    %c0_i32 = arith.constant 0 : i32
    %c0_i32_0 = arith.constant 0 : i32
    return %c0_i32, %arg1 : i32, i32
  }
  func.func @transform_3(%arg0: i32, %arg1: i32, %arg2: i32) -> (i32, i32) {
    %c0_i32 = arith.constant 0 : i32
    return %arg0, %arg1 : i32, i32
  }
}

</mosaic_0001>

<bundles_post_ra>
// kernel: snnl_forward.4
= control target key start
LH: loop header
LB: loop body
LE: loop exit
PB: predicated region body
PF: predicated region fallthrough
CT: control target
= control target key end

     0   :  { %vm19_vm0 = vcmask 523264   ;;  %v1065_v24 = vmov 0.0   ;;  %vm832_vm1 = vcmask 519168   ;;  %s1546_s1 = inlined_call_operand.vmem [shape: bf16[64,64], index: 1, kind: input, shape index: {}]   ;;  %s1547_s2 = inlined_call_operand.vmem [shape: f32[1,64], index: 2, kind: input, shape index: {}]   ;;  %s1548_s0 = inlined_call_operand.vmem [shape: bf16[392,64], index: 0, kind: input, shape index: {}]   ;;  %s1549_s3 = inlined_call_operand.vmem [shape: bf16[392,64], index: 3, kind: output, shape index: {}]  }
   0x1   :  { %v1050_v0 = vld [vmem:[%s1546_s1 + $0x18] sm:$0xff]  ;;  %v1049_v1 = vld [vmem:[%s1546_s1 + $0x10] sm:$0xff]  ;;  %v1048_v2 = vld [vmem:[%s1546_s1 + $0x8] sm:$0xff]  ;;  %44 = vst.msk [vmem:[#allocation2 + $0xc0] sm:$0xff] %vm19_vm0, %v1065_v24 }
   0x2   :  { %1052 = vmatpush.bf16.msra.mxu2 %v1050_v0  ;;  %402 = vmatpush.bf16.msra.mxu0 %v1050_v0  ;;  %v1047_v3 = vld [vmem:[%s1546_s1] sm:$0xff]  ;;  %v1029_v6 = vld [vmem:[%s1548_s0 + $0x30] sm:$0xff]  ;;  %v1042_v7 = vld [vmem:[%s1548_s0 + $0x98] sm:$0xff]  ;;  %20 = vst.msk [vmem:[#allocation2] sm:$0xff] %vm19_vm0, %v1065_v24 }
   0x3   :  { %1051 = vmatpush.bf16.msra.mxu1 %v1050_v0  ;;  %1053 = vmatpush.bf16.msra.mxu3 %v1050_v0  ;;  %v1035_v4 = vld [vmem:[%s1548_s0 + $0x60] sm:$0xff]  ;;  %v1036_v8 = vld [vmem:[%s1548_s0 + $0x68] sm:$0xff]  ;;  %v1030_v10 = vld [vmem:[%s1548_s0 + $0x38] sm:$0xff]  ;;  %21 = vst.msk [vmem:[#allocation2 + $0x8] sm:$0xff] %vm19_vm0, %v1065_v24 }
   0x4   :  { %v1023_v5 = vld [vmem:[%s1548_s0] sm:$0xff]  ;;  %v1024_v9 = vld [vmem:[%s1548_s0 + $0x8] sm:$0xff]  ;;  %v1037_v12 = vld [vmem:[%s1548_s0 + $0x70] sm:$0xff]  ;;  %22 = vst.msk [vmem:[#allocation2 + $0x10] sm:$0xff] %vm19_vm0, %v1065_v24 }
   0x5   :  { %v1043_v11 = vld [vmem:[%s1548_s0 + $0xa0] sm:$0xff]  ;;  %v1025_v13 = vld [vmem:[%s1548_s0 + $0x10] sm:$0xff]  ;;  %v1044_v15 = vld [vmem:[%s1548_s0 + $0xa8] sm:$0xff]  ;;  %23 = vst.msk [vmem:[#allocation2 + $0x18] sm:$0xff] %vm19_vm0, %v1065_v24 }
   0x6   :  { %1055 = vmatpush.bf16.msra.mxu2 %v1049_v1  ;;  %403 = vmatpush.bf16.msra.mxu0 %v1049_v1  ;;  %v1031_v14 = vld [vmem:[%s1548_s0 + $0x40] sm:$0xff]  ;;  %v1038_v16 = vld [vmem:[%s1548_s0 + $0x78] sm:$0xff]  ;;  %v1032_v18 = vld [vmem:[%s1548_s0 + $0x48] sm:$0xff]  ;;  %24 = vst.msk [vmem:[#allocation2 + $0x20] sm:$0xff] %vm19_vm0, %v1065_v24 }
   0x7   :  { %1054 = vmatpush.bf16.msra.mxu1 %v1049_v1  ;;  %1056 = vmatpush.bf16.msra.mxu3 %v1049_v1  ;;  %v1026_v17 = vld [vmem:[%s1548_s0 + $0x18] sm:$0xff]  ;;  %v1045_v19 = vld [vmem:[%s1548_s0 + $0xb0] sm:$0xff]  ;;  %v1039_v20 = vld [vmem:[%s1548_s0 + $0x80] sm:$0xff]  ;;  %25 = vst.msk [vmem:[#allocation2 + $0x28] sm:$0xff] %vm19_vm0, %v1065_v24 }
   0x8   :  { %v1027_v21 = vld [vmem:[%s1548_s0 + $0x20] sm:$0xff]  ;;  %v1033_v22 = vld [vmem:[%s1548_s0 + $0x50] sm:$0xff]  ;;  %v1046_v23 = vld [vmem:[%s1548_s0 + $0xb8] sm:$0xff]  ;;  %26 = vst.msk [vmem:[#allocation2 + $0x30] sm:$0xff] %vm19_vm0, %v1065_v24 }
   0x9   :  { %v166_v25 = vld [vmem:[%s1548_s0 + $0xc0] sm:$0xf]  ;;  %27 = vst.msk [vmem:[#allocation2 + $0x38] sm:$0xff] %vm19_vm0, %v1065_v24  ;;  %v1040_v27 = vld [vmem:[%s1548_s0 + $0x88] sm:$0xff]  ;;  %v1034_v29 = vld [vmem:[%s1548_s0 + $0x58] sm:$0xff] }
   0xa   :  { %1058 = vmatpush.bf16.msra.mxu2 %v1048_v2  ;;  %404 = vmatpush.bf16.msra.mxu0 %v1048_v2  ;;  %v272_v26 = vunpack.c.l.b16 %v166_v25  ;;  %28 = vst.msk [vmem:[#allocation2 + $0x40] sm:$0xff] %vm19_vm0, %v1065_v24  ;;  %v1028_v28 = vld [vmem:[%s1548_s0 + $0x28] sm:$0xff]  ;;  %v1041_v31 = vld [vmem:[%s1548_s0 + $0x90] sm:$0xff]  ;;  %v69_v32 = vld [vmem:[#allocation2] sm:$0xff] }
   0xb   :  { %1057 = vmatpush.bf16.msra.mxu1 %v1048_v2  ;;  %1059 = vmatpush.bf16.msra.mxu3 %v1048_v2  ;;  %29 = vst.msk [vmem:[#allocation2 + $0x48] sm:$0xff] %vm19_vm0, %v1065_v24  ;;  %v93_v38 = vld [vmem:[#allocation2 + $0xc0] sm:$0xff]  ;;  %v70_v41 = vld [vmem:[#allocation2 + $0x8] sm:$0xff]  ;;  %v71_v59 = vld [vmem:[#allocation2 + $0x10] sm:$0xff] }
   0xc   :  { %30 = vst.msk [vmem:[#allocation2 + $0x50] sm:$0xff] %vm19_vm0, %v1065_v24  ;;  %v297_v30 = vpack.c.b16 %v272_v26, %v272_v26  ;;  %v1253_v47 = vld [vmem:[%s1547_s2] ss:$0 sm:$0xff] }
   0xd   :  { %31 = vst.msk [vmem:[#allocation2 + $0x58] sm:$0xff] %vm19_vm0, %v1065_v24 }
   0xe   :  { %1061 = vmatpush.bf16.msra.mxu2 %v1047_v3  ;;  %405 = vmatpush.bf16.msra.mxu0 %v1047_v3  ;;  %32 = vst.msk [vmem:[#allocation2 + $0x60] sm:$0xff] %vm19_vm0, %v1065_v24 }
   0xf   :  { %1060 = vmatpush.bf16.msra.mxu1 %v1047_v3  ;;  %1062 = vmatpush.bf16.msra.mxu3 %v1047_v3  ;;  %33 = vst.msk [vmem:[#allocation2 + $0x68] sm:$0xff] %vm19_vm0, %v1065_v24 }
  0x10   :  { %34 = vst.msk [vmem:[#allocation2 + $0x70] sm:$0xff] %vm19_vm0, %v1065_v24 }
  0x11   :  { %1010 = vmatmul.msk.bf16.vlgmr.msra.gmra.mxu2 %vm19_vm0, %v1035_v4  ;;  %998 = vmatmul.msk.bf16.vlgmr.msra.gmra.mxu0 %vm19_vm0, %v1023_v5  ;;  %35 = vst.msk [vmem:[#allocation2 + $0x78] sm:$0xff] %vm19_vm0, %v1065_v24 }
  0x12   :  { %1004 = vmatmul.msk.bf16.vlgmr.msra.gmra.mxu1 %vm19_vm0, %v1029_v6  ;;  %1017 = vmatmul.msk.bf16.vlgmr.msra.gmra.mxu3 %vm19_vm0, %v1042_v7  ;;  %36 = vst.msk [vmem:[#allocation2 + $0x80] sm:$0xff] %vm19_vm0, %v1065_v24 }
  0x13   :  { %37 = vst.msk [vmem:[#allocation2 + $0x88] sm:$0xff] %vm19_vm0, %v1065_v24 }
  0x14   :  { %38 = vst.msk [vmem:[#allocation2 + $0x90] sm:$0xff] %vm19_vm0, %v1065_v24 }
  0x15   :  { %39 = vst.msk [vmem:[#allocation2 + $0x98] sm:$0xff] %vm19_vm0, %v1065_v24  ;;  %v81_v33 = vld [vmem:[#allocation2 + $0x60] sm:$0xff] }
  0x16   :  { %40 = vst.msk [vmem:[#allocation2 + $0xa0] sm:$0xff] %vm19_vm0, %v1065_v24  ;;  %v82_v43 = vld [vmem:[#allocation2 + $0x68] sm:$0xff] }
  0x17   :  { %41 = vst.msk [vmem:[#allocation2 + $0xa8] sm:$0xff] %vm19_vm0, %v1065_v24  ;;  %v83_v62 = vld [vmem:[#allocation2 + $0x70] sm:$0xff] }
  0x18   :  { %42 = vst.msk [vmem:[#allocation2 + $0xb0] sm:$0xff] %vm19_vm0, %v1065_v24  ;;  %v84_v26 = vld [vmem:[#allocation2 + $0x78] sm:$0xff] }
  0x19   :  { %43 = vst.msk [vmem:[#allocation2 + $0xb8] sm:$0xff] %vm19_vm0, %v1065_v24 }
  0x1a   :  { %45 = vst.msk [vmem:[#allocation2 + $0xc8] sm:$0xff] %vm19_vm0, %v1065_v24 }
  0x1b   :  { %46 = vst.msk [vmem:[#allocation2 + $0xd0] sm:$0xff] %vm19_vm0, %v1065_v24 }
  0x1c   :  { %47 = vst.msk [vmem:[#allocation2 + $0xd8] sm:$0xff] %vm19_vm0, %v1065_v24 }
  0x1d   :  { %48 = vst.msk [vmem:[#allocation2 + $0xe0] sm:$0xff] %vm19_vm0, %v1065_v24 }
  0x1e   :  { %49 = vst.msk [vmem:[#allocation2 + $0xe8] sm:$0xff] %vm19_vm0, %v1065_v24 }
  0x1f   :  { %50 = vst.msk [vmem:[#allocation2 + $0xf0] sm:$0xff] %vm19_vm0, %v1065_v24 }
  0x20   :  { %51 = vst.msk [vmem:[#allocation2 + $0xf8] sm:$0xff] %vm19_vm0, %v1065_v24 }
  0x21   :  { %1011 = vmatmul.msk.bf16.gmra.mxu2 %vm19_vm0, %v1036_v8  ;;  %999 = vmatmul.msk.bf16.gmra.mxu0 %vm19_vm0, %v1024_v9  ;;  %52 = vst.msk [vmem:[#allocation2 + $0x100] sm:$0xff] %vm19_vm0, %v1065_v24  ;;  %v94_v55 = vld [vmem:[#allocation2 + $0xc8] sm:$0xff] }
  0x22   :  { %1005 = vmatmul.msk.bf16.gmra.mxu1 %vm19_vm0, %v1030_v10  ;;  %1018 = vmatmul.msk.bf16.gmra.mxu3 %vm19_vm0, %v1043_v11  ;;  %53 = vst.msk [vmem:[#allocation2 + $0x108] sm:$0xff] %vm19_vm0, %v1065_v24 }
  0x23   :  { %54 = vst.msk [vmem:[#allocation2 + $0x110] sm:$0xff] %vm19_vm0, %v1065_v24 }
  0x24   :  { %55 = vst.msk [vmem:[#allocation2 + $0x118] sm:$0xff] %vm19_vm0, %v1065_v24 }
  0x25   :  { %56 = vst.msk [vmem:[#allocation2 + $0x120] sm:$0xff] %vm19_vm0, %v1065_v24 }
  0x26   :  { %57 = vst.msk [vmem:[#allocation2 + $0x128] sm:$0xff] %vm19_vm0, %v1065_v24 }
  0x27   :  { %58 = vst.msk [vmem:[#allocation2 + $0x130] sm:$0xff] %vm19_vm0, %v1065_v24 }
  0x28   :  { %59 = vst.msk [vmem:[#allocation2 + $0x138] sm:$0xff] %vm19_vm0, %v1065_v24 }
  0x29   :  { %60 = vst.msk [vmem:[#allocation2 + $0x140] sm:$0xff] %vm19_vm0, %v1065_v24 }
  0x2a   :  { %61 = vst.msk [vmem:[#allocation2 + $0x148] sm:$0xff] %vm19_vm0, %v1065_v24 }
  0x2b   :  { %62 = vst.msk [vmem:[#allocation2 + $0x150] sm:$0xff] %vm19_vm0, %v1065_v24 }
  0x2c   :  { %63 = vst.msk [vmem:[#allocation2 + $0x158] sm:$0xff] %vm19_vm0, %v1065_v24 }
  0x2d   :  { %64 = vst.msk [vmem:[#allocation2 + $0x160] sm:$0xff] %vm19_vm0, %v1065_v24 }
  0x2e   :  { %65 = vst.msk [vmem:[#allocation2 + $0x168] sm:$0xff] %vm19_vm0, %v1065_v24  ;;  %v107_v39 = vld [vmem:[#allocation2 + $0x130] sm:$0xff] }
  0x2f   :  { %66 = vst.msk [vmem:[#allocation2 + $0x170] sm:$0xff] %vm19_vm0, %v1065_v24  ;;  %v108_v63 = vld [vmem:[#allocation2 + $0x138] sm:$0xff] }
  0x30   :  { %67 = vst.msk [vmem:[#allocation2 + $0x178] sm:$0xff] %vm19_vm0, %v1065_v24 }
  0x31   :  { %1012 = vmatmul.msk.bf16.gmra.mxu2 %vm19_vm0, %v1037_v12  ;;  %1000 = vmatmul.msk.bf16.gmra.mxu0 %vm19_vm0, %v1025_v13  ;;  %68 = vst.msk [vmem:[#allocation2 + $0x180] sm:$0xff] %vm19_vm0, %v1065_v24 }
  0x32   :  { %1006 = vmatmul.msk.bf16.gmra.mxu1 %vm19_vm0, %v1031_v14  ;;  %1019 = vmatmul.msk.bf16.gmra.mxu3 %vm19_vm0, %v1044_v15 }
  0x41   :  { %1013 = vmatmul.msk.bf16.gmra.mxu2 %vm19_vm0, %v1038_v16  ;;  %1001 = vmatmul.msk.bf16.gmra.mxu0 %vm19_vm0, %v1026_v17  ;;  %v95_v16 = vld [vmem:[#allocation2 + $0xd0] sm:$0xff] }
  0x42   :  { %1007 = vmatmul.msk.bf16.gmra.mxu1 %vm19_vm0, %v1032_v18  ;;  %1020 = vmatmul.msk.bf16.gmra.mxu3 %vm19_vm0, %v1045_v19 }
  0x51   :  { %1014 = vmatmul.msk.bf16.gmra.mxu2 %vm19_vm0, %v1039_v20  ;;  %1002 = vmatmul.msk.bf16.gmra.mxu0 %vm19_vm0, %v1027_v21 }
  0x52   :  { %1008 = vmatmul.msk.bf16.gmra.mxu1 %vm19_vm0, %v1033_v22  ;;  %1021 = vmatmul.msk.bf16.gmra.mxu3 %vm19_vm0, %v1046_v23  ;;  %v72_v23 = vld [vmem:[#allocation2 + $0x18] sm:$0xff] }
  0x61   :  { %1015 = vmatmul.msk.bf16.gmra.mxu2 %vm19_vm0, %v1040_v27  ;;  %1003 = vmatmul.msk.bf16.gmra.mxu0 %vm19_vm0, %v1028_v28  ;;  %v109_v27 = vld [vmem:[#allocation2 + $0x140] sm:$0xff] }
  0x62   :  { %1009 = vmatmul.msk.bf16.gmra.mxu1 %vm19_vm0, %v1034_v29  ;;  %1022 = vmatmul.msk.bf16.gmra.mxu3 %vm19_vm0, %v297_v30 }
  0x71   :  { %1016 = vmatmul.msk.bf16.gmra.mxu2 %vm19_vm0, %v1041_v31 }
  0x8e   :  { %v407_v34 = vpop.f32.mrf.mxu0 }
  0x8f   :  { %v531_v35 = vadd.f32 %v407_v34, %v69_v32  ;;  %v437_v36 = vpop.f32.mrf.mxu1 }
  0x90   :  { %v543_v37 = vadd.f32 %v437_v36, %v81_v33 }
  0x91   :  { %580 = vst.msk [vmem:[#allocation2] sm:$0xff] %vm19_vm0, %v531_v35 }
  0x92   :  { %592 = vst.msk [vmem:[#allocation2 + $0x60] sm:$0xff] %vm19_vm0, %v543_v37 }
  0x94   :  { %v467_v40 = vpop.f32.mrf.mxu2 }
  0x95   :  { %v555_v42 = vadd.f32 %v467_v40, %v93_v38  ;;  %v502_v44 = vpop.f32.mrf.mxu3 }
  0x96   :  { %v409_v45 = vpop.f32.mrf.mxu0  ;;  %v569_v46 = vadd.f32 %v502_v44, %v107_v39 }
  0x97   :  { %604 = vst.msk [vmem:[#allocation2 + $0xc0] sm:$0xff] %vm19_vm0, %v555_v42  ;;  %v532_v48 = vadd.f32 %v409_v45, %v70_v41  ;;  %v439_v49 = vpop.f32.mrf.mxu1  ;;  %v96_v42 = vld [vmem:[#allocation2 + $0xd8] sm:$0xff] }
  0x98   :  { %v632_v50 = vld [vmem:[#allocation2] sm:$0xff]  ;;  %v544_v51 = vadd.f32 %v439_v49, %v82_v43  ;;  %618 = vst.msk [vmem:[#allocation2 + $0x130] sm:$0xff] %vm19_vm0, %v569_v46 }
  0x99   :  { %v685_v52 = vadd.f32 %v1253_v47, %v632_v50  ;;  %v644_v53 = vld [vmem:[#allocation2 + $0x60] sm:$0xff]  ;;  %581 = vst.msk [vmem:[#allocation2 + $0x8] sm:$0xff] %vm19_vm0, %v532_v48 }
  0x9a   :  { %v697_v54 = vadd.f32 %v1253_v47, %v644_v53  ;;  %593 = vst.msk [vmem:[#allocation2 + $0x68] sm:$0xff] %vm19_vm0, %v544_v51  ;;  %v73_v50 = vld [vmem:[#allocation2 + $0x20] sm:$0xff] }
  0x9b   :  { %v734_v56 = vmax.f32 %v685_v52, 0.0 }
  0x9c   :  { %v746_v57 = vmax.f32 %v697_v54, 0.0  ;;  %v469_v58 = vpop.f32.mrf.mxu2 }
  0x9d   :  { %v783_v60 = vpack.c.bf16 %v734_v56, %v734_v56  ;;  %v556_v61 = vadd.f32 %v469_v58, %v94_v55  ;;  %v504_v0 = vpop.f32.mrf.mxu3  ;;  %v85_v56 = vld [vmem:[#allocation2 + $0x80] sm:$0xff] }
  0x9e   :  { %v656_v1 = vld [vmem:[#allocation2 + $0xc0] sm:$0xff]  ;;  %v795_v2 = vpack.c.bf16 %v746_v57, %v746_v57  ;;  %v412_v3 = vpop.f32.mrf.mxu0  ;;  %v570_v11 = vadd.f32 %v504_v0, %v108_v63 }
  0x9f   :  { %v709_v4 = vadd.f32 %v1253_v47, %v656_v1  ;;  %833 = vst.msk [vmem:[%s1549_s3] sm:$0xf] %vm832_vm1, %v783_v60  ;;  %v670_v5 = vld [vmem:[#allocation2 + $0x130] sm:$0xff]  ;;  %v533_v6 = vadd.f32 %v412_v3, %v71_v59  ;;  %v442_v7 = vpop.f32.mrf.mxu1  ;;  %v110_v59 = vld [vmem:[#allocation2 + $0x148] sm:$0xff] }
  0xa0   :  { %845 = vst.msk [vmem:[%s1549_s3 + $0x30] sm:$0xf] %vm832_vm1, %v795_v2  ;;  %v633_v8 = vld [vmem:[#allocation2 + $0x8] sm:$0xff]  ;;  %v723_v9 = vadd.f32 %v1253_v47, %v670_v5  ;;  %v545_v10 = vadd.f32 %v442_v7, %v83_v62  ;;  %v97_v7 = vld [vmem:[#allocation2 + $0xe0] sm:$0xff] }
  0xa1   :  { %v758_v12 = vmax.f32 %v709_v4, 0.0  ;;  %605 = vst.msk [vmem:[#allocation2 + $0xc8] sm:$0xff] %vm19_vm0, %v556_v61  ;;  %v686_v13 = vadd.f32 %v1253_v47, %v633_v8  ;;  %v645_v14 = vld [vmem:[#allocation2 + $0x68] sm:$0xff] }
  0xa2   :  { %v698_v15 = vadd.f32 %v1253_v47, %v645_v14  ;;  %v772_v17 = vmax.f32 %v723_v9, 0.0  ;;  %582 = vst.msk [vmem:[#allocation2 + $0x10] sm:$0xff] %vm19_vm0, %v533_v6  ;;  %v74_v14 = vld [vmem:[#allocation2 + $0x28] sm:$0xff] }
  0xa3   :  { %v807_v18 = vpack.c.bf16 %v758_v12, %v758_v12  ;;  %v735_v19 = vmax.f32 %v686_v13, 0.0  ;;  %594 = vst.msk [vmem:[#allocation2 + $0x70] sm:$0xff] %vm19_vm0, %v545_v10 }
  0xa4   :  { %v747_v20 = vmax.f32 %v698_v15, 0.0  ;;  %v472_v21 = vpop.f32.mrf.mxu2  ;;  %v821_v22 = vpack.c.bf16 %v772_v17, %v772_v17  ;;  %619 = vst.msk [vmem:[#allocation2 + $0x138] sm:$0xff] %vm19_vm0, %v570_v11 }
  0xa5   :  { %857 = vst.msk [vmem:[%s1549_s3 + $0x60] sm:$0xf] %vm832_vm1, %v807_v18  ;;  %v784_v24 = vpack.c.bf16 %v735_v19, %v735_v19  ;;  %v557_v25 = vadd.f32 %v472_v21, %v95_v16  ;;  %v507_v28 = vpop.f32.mrf.mxu3 }
  0xa6   :  { %v796_v29 = vpack.c.bf16 %v747_v20, %v747_v20  ;;  %871 = vst.msk [vmem:[%s1549_s3 + $0x98] sm:$0xf] %vm832_vm1, %v821_v22  ;;  %v414_v30 = vpop.f32.mrf.mxu0  ;;  %v571_v35 = vadd.f32 %v507_v28, %v109_v27  ;;  %v86_v20 = vld [vmem:[#allocation2 + $0x88] sm:$0xff] }
  0xa7   :  { %834 = vst.msk [vmem:[%s1549_s3 + $0x4] sm:$0xf] %vm832_vm1, %v784_v24  ;;  %v534_v31 = vadd.f32 %v414_v30, %v72_v23  ;;  %v444_v32 = vpop.f32.mrf.mxu1  ;;  %v111_v23 = vld [vmem:[#allocation2 + $0x150] sm:$0xff] }
  0xa8   :  { %v657_v33 = vld [vmem:[#allocation2 + $0xc8] sm:$0xff]  ;;  %846 = vst.msk [vmem:[%s1549_s3 + $0x34] sm:$0xf] %vm832_vm1, %v796_v29  ;;  %v546_v34 = vadd.f32 %v444_v32, %v84_v26 }
  0xa9   :  { %v710_v36 = vadd.f32 %v1253_v47, %v657_v33  ;;  %606 = vst.msk [vmem:[#allocation2 + $0xd0] sm:$0xff] %vm19_vm0, %v557_v25  ;;  %v634_v37 = vld [vmem:[#allocation2 + $0x10] sm:$0xff]  ;;  %v98_v29 = vld [vmem:[#allocation2 + $0xe8] sm:$0xff] }
  0xaa   :  { %v687_v38 = vadd.f32 %v1253_v47, %v634_v37  ;;  %v646_v39 = vld [vmem:[#allocation2 + $0x70] sm:$0xff]  ;;  %583 = vst.msk [vmem:[#allocation2 + $0x18] sm:$0xff] %vm19_vm0, %v534_v31 }
  0xab   :  { %v759_v40 = vmax.f32 %v710_v36, 0.0  ;;  %v699_v41 = vadd.f32 %v1253_v47, %v646_v39  ;;  %v671_v43 = vld [vmem:[#allocation2 + $0x138] sm:$0xff]  ;;  %595 = vst.msk [vmem:[#allocation2 + $0x78] sm:$0xff] %vm19_vm0, %v546_v34  ;;  %v75_v36 = vld [vmem:[#allocation2 + $0x30] sm:$0xff] }
  0xac   :  { %v736_v44 = vmax.f32 %v687_v38, 0.0  ;;  %v474_v45 = vpop.f32.mrf.mxu2  ;;  %v724_v46 = vadd.f32 %v1253_v47, %v671_v43  ;;  %620 = vst.msk [vmem:[#allocation2 + $0x140] sm:$0xff] %vm19_vm0, %v571_v35 }
  0xad   :  { %v808_v48 = vpack.c.bf16 %v759_v40, %v759_v40  ;;  %v748_v49 = vmax.f32 %v699_v41, 0.0  ;;  %v509_v51 = vpop.f32.mrf.mxu3  ;;  %v558_v53 = vadd.f32 %v474_v45, %v96_v42  ;;  %v87_v45 = vld [vmem:[#allocation2 + $0x90] sm:$0xff] }
  0xae   :  { %v785_v52 = vpack.c.bf16 %v736_v44, %v736_v44  ;;  %v773_v54 = vmax.f32 %v724_v46, 0.0  ;;  %v417_v55 = vpop.f32.mrf.mxu0  ;;  %v572_v4 = vadd.f32 %v509_v51, %v110_v59 }
  0xaf   :  { %858 = vst.msk [vmem:[%s1549_s3 + $0x64] sm:$0xf] %vm832_vm1, %v808_v48  ;;  %v797_v57 = vpack.c.bf16 %v748_v49, %v748_v49  ;;  %v447_v58 = vpop.f32.mrf.mxu1  ;;  %v535_v62 = vadd.f32 %v417_v55, %v73_v50  ;;  %v112_v50 = vld [vmem:[#allocation2 + $0x158] sm:$0xff] }
  0xb0   :  { %v658_v60 = vld [vmem:[#allocation2 + $0xd0] sm:$0xff]  ;;  %835 = vst.msk [vmem:[%s1549_s3 + $0x8] sm:$0xf] %vm832_vm1, %v785_v52  ;;  %v822_v61 = vpack.c.bf16 %v773_v54, %v773_v54  ;;  %v547_v1 = vadd.f32 %v447_v58, %v85_v56 }
  0xb1   :  { %v711_v63 = vadd.f32 %v1253_v47, %v658_v60  ;;  %847 = vst.msk [vmem:[%s1549_s3 + $0x38] sm:$0xf] %vm832_vm1, %v797_v57  ;;  %v635_v0 = vld [vmem:[#allocation2 + $0x18] sm:$0xff]  ;;  %v99_v58 = vld [vmem:[#allocation2 + $0xf0] sm:$0xff] }
  0xb2   :  { %607 = vst.msk [vmem:[#allocation2 + $0xd8] sm:$0xff] %vm19_vm0, %v558_v53  ;;  %v688_v2 = vadd.f32 %v1253_v47, %v635_v0  ;;  %v647_v3 = vld [vmem:[#allocation2 + $0x78] sm:$0xff] }
  0xb3   :  { %v760_v5 = vmax.f32 %v711_v63, 0.0  ;;  %872 = vst.msk [vmem:[%s1549_s3 + $0x9c] sm:$0xf] %vm832_vm1, %v822_v61  ;;  %v700_v6 = vadd.f32 %v1253_v47, %v647_v3  ;;  %v672_v8 = vld [vmem:[#allocation2 + $0x140] sm:$0xff] }
  0xb4   :  { %v737_v9 = vmax.f32 %v688_v2, 0.0  ;;  %v477_v10 = vpop.f32.mrf.mxu2  ;;  %v725_v11 = vadd.f32 %v1253_v47, %v672_v8  ;;  %584 = vst.msk [vmem:[#allocation2 + $0x20] sm:$0xff] %vm19_vm0, %v535_v62 }
  0xb5   :  { %v809_v12 = vpack.c.bf16 %v760_v5, %v760_v5  ;;  %v749_v13 = vmax.f32 %v700_v6, 0.0  ;;  %596 = vst.msk [vmem:[#allocation2 + $0x80] sm:$0xff] %vm19_vm0, %v547_v1  ;;  %v512_v15 = vpop.f32.mrf.mxu3  ;;  %v559_v17 = vadd.f32 %v477_v10, %v97_v7  ;;  %v76_v1 = vld [vmem:[#allocation2 + $0x38] sm:$0xff] }
  0xb6   :  { %v786_v16 = vpack.c.bf16 %v737_v9, %v737_v9  ;;  %v774_v18 = vmax.f32 %v725_v11, 0.0  ;;  %621 = vst.msk [vmem:[#allocation2 + $0x148] sm:$0xff] %vm19_vm0, %v572_v4  ;;  %v419_v19 = vpop.f32.mrf.mxu0  ;;  %v573_v30 = vadd.f32 %v512_v15, %v111_v23  ;;  %v100_v23 = vld [vmem:[#allocation2 + $0xf8] sm:$0xff] }
  0xb7   :  { %859 = vst.msk [vmem:[%s1549_s3 + $0x68] sm:$0xf] %vm832_vm1, %v809_v12  ;;  %v798_v21 = vpack.c.bf16 %v749_v13, %v749_v13  ;;  %v449_v22 = vpop.f32.mrf.mxu1  ;;  %v536_v25 = vadd.f32 %v419_v19, %v74_v14  ;;  %v88_v14 = vld [vmem:[#allocation2 + $0x98] sm:$0xff] }
  0xb8   :  { %836 = vst.msk [vmem:[%s1549_s3 + $0xc] sm:$0xf] %vm832_vm1, %v786_v16  ;;  %v823_v24 = vpack.c.bf16 %v774_v18, %v774_v18  ;;  %v548_v27 = vadd.f32 %v449_v22, %v86_v20 }
  0xb9   :  { %v659_v26 = vld [vmem:[#allocation2 + $0xd8] sm:$0xff]  ;;  %848 = vst.msk [vmem:[%s1549_s3 + $0x3c] sm:$0xf] %vm832_vm1, %v798_v21 }
  0xba   :  { %v712_v28 = vadd.f32 %v1253_v47, %v659_v26  ;;  %608 = vst.msk [vmem:[#allocation2 + $0xe0] sm:$0xff] %vm19_vm0, %v559_v17 }
  0xbb   :  { %873 = vst.msk [vmem:[%s1549_s3 + $0xa0] sm:$0xf] %vm832_vm1, %v823_v24  ;;  %v636_v31 = vld [vmem:[#allocation2 + $0x20] sm:$0xff] }
  0xbc   :  { %v761_v32 = vmax.f32 %v712_v28, 0.0  ;;  %v689_v33 = vadd.f32 %v1253_v47, %v636_v31  ;;  %v648_v34 = vld [vmem:[#allocation2 + $0x80] sm:$0xff]  ;;  %v479_v35 = vpop.f32.mrf.mxu2  ;;  %585 = vst.msk [vmem:[#allocation2 + $0x28] sm:$0xff] %vm19_vm0, %v536_v25 }
  0xbd   :  { %v701_v37 = vadd.f32 %v1253_v47, %v648_v34  ;;  %v560_v38 = vadd.f32 %v479_v35, %v98_v29  ;;  %v673_v39 = vld [vmem:[#allocation2 + $0x148] sm:$0xff]  ;;  %597 = vst.msk [vmem:[#allocation2 + $0x88] sm:$0xff] %vm19_vm0, %v548_v27  ;;  %v514_v40 = vpop.f32.mrf.mxu3  ;;  %v113_v25 = vld [vmem:[#allocation2 + $0x160] sm:$0xff] }
  0xbe   :  { %v810_v41 = vpack.c.bf16 %v761_v32, %v761_v32  ;;  %v738_v42 = vmax.f32 %v689_v33, 0.0  ;;  %v726_v43 = vadd.f32 %v1253_v47, %v673_v39  ;;  %622 = vst.msk [vmem:[#allocation2 + $0x150] sm:$0xff] %vm19_vm0, %v573_v30  ;;  %v422_v44 = vpop.f32.mrf.mxu0  ;;  %v574_v59 = vadd.f32 %v514_v40, %v112_v50  ;;  %v77_v30 = vld [vmem:[#allocation2 + $0x40] sm:$0xff] }
  0xbf   :  { %v750_v46 = vmax.f32 %v701_v37, 0.0  ;;  %609 = vst.msk [vmem:[#allocation2 + $0xe8] sm:$0xff] %vm19_vm0, %v560_v38  ;;  %v537_v48 = vadd.f32 %v422_v44, %v75_v36  ;;  %v452_v49 = vpop.f32.mrf.mxu1 }
  0xc0   :  { %860 = vst.msk [vmem:[%s1549_s3 + $0x6c] sm:$0xf] %vm832_vm1, %v810_v41  ;;  %v787_v51 = vpack.c.bf16 %v738_v42, %v738_v42  ;;  %v775_v52 = vmax.f32 %v726_v43, 0.0  ;;  %v549_v55 = vadd.f32 %v452_v49, %v87_v45  ;;  %v89_v43 = vld [vmem:[#allocation2 + $0xa0] sm:$0xff] }
  0xc1   :  { %v660_v53 = vld [vmem:[#allocation2 + $0xe0] sm:$0xff]  ;;  %v799_v54 = vpack.c.bf16 %v750_v46, %v750_v46  ;;  %586 = vst.msk [vmem:[#allocation2 + $0x30] sm:$0xff] %vm19_vm0, %v537_v48 }
  0xc2   :  { %v713_v56 = vadd.f32 %v1253_v47, %v660_v53  ;;  %837 = vst.msk [vmem:[%s1549_s3 + $0x10] sm:$0xf] %vm832_vm1, %v787_v51  ;;  %v824_v57 = vpack.c.bf16 %v775_v52, %v775_v52  ;;  %v101_v52 = vld [vmem:[#allocation2 + $0x100] sm:$0xff] }
  0xc3   :  { %849 = vst.msk [vmem:[%s1549_s3 + $0x40] sm:$0xf] %vm832_vm1, %v799_v54  ;;  %v637_v60 = vld [vmem:[#allocation2 + $0x28] sm:$0xff] }
  0xc4   :  { %v762_v61 = vmax.f32 %v713_v56, 0.0  ;;  %874 = vst.msk [vmem:[%s1549_s3 + $0xa4] sm:$0xf] %vm832_vm1, %v824_v57  ;;  %v690_v62 = vadd.f32 %v1253_v47, %v637_v60  ;;  %v649_v63 = vld [vmem:[#allocation2 + $0x88] sm:$0xff]  ;;  %v482_v0 = vpop.f32.mrf.mxu2 }
  0xc5   :  { %v702_v2 = vadd.f32 %v1253_v47, %v649_v63  ;;  %v561_v3 = vadd.f32 %v482_v0, %v99_v58  ;;  %v674_v4 = vld [vmem:[#allocation2 + $0x150] sm:$0xff]  ;;  %598 = vst.msk [vmem:[#allocation2 + $0x90] sm:$0xff] %vm19_vm0, %v549_v55  ;;  %v517_v5 = vpop.f32.mrf.mxu3  ;;  %v114_v54 = vld [vmem:[#allocation2 + $0x168] sm:$0xff] }
  0xc6   :  { %v811_v6 = vpack.c.bf16 %v762_v61, %v762_v61  ;;  %v661_v7 = vld [vmem:[#allocation2 + $0xe8] sm:$0xff]  ;;  %v739_v8 = vmax.f32 %v690_v62, 0.0  ;;  %v727_v9 = vadd.f32 %v1253_v47, %v674_v4  ;;  %623 = vst.msk [vmem:[#allocation2 + $0x158] sm:$0xff] %vm19_vm0, %v574_v59  ;;  %v424_v10 = vpop.f32.mrf.mxu0  ;;  %v575_v35 = vadd.f32 %v517_v5, %v113_v25 }
  0xc7   :  { %v714_v11 = vadd.f32 %v1253_v47, %v661_v7  ;;  %v751_v12 = vmax.f32 %v702_v2, 0.0  ;;  %610 = vst.msk [vmem:[#allocation2 + $0xf0] sm:$0xff] %vm19_vm0, %v561_v3  ;;  %v538_v13 = vadd.f32 %v424_v10, %v76_v1  ;;  %v454_v15 = vpop.f32.mrf.mxu1  ;;  %v78_v58 = vld [vmem:[#allocation2 + $0x48] sm:$0xff]  ;;  %v115_v3 = vld [vmem:[#allocation2 + $0x170] sm:$0xff] }
  0xc8   :  { %861 = vst.msk [vmem:[%s1549_s3 + $0x70] sm:$0xf] %vm832_vm1, %v811_v6  ;;  %v788_v16 = vpack.c.bf16 %v739_v8, %v739_v8  ;;  %v776_v17 = vmax.f32 %v727_v9, 0.0  ;;  %v638_v18 = vld [vmem:[#allocation2 + $0x30] sm:$0xff]  ;;  %v550_v24 = vadd.f32 %v454_v15, %v88_v14  ;;  %v90_v63 = vld [vmem:[#allocation2 + $0xa8] sm:$0xff] }
  0xc9   :  { %v763_v19 = vmax.f32 %v714_v11, 0.0  ;;  %v800_v20 = vpack.c.bf16 %v751_v12, %v751_v12  ;;  %v691_v21 = vadd.f32 %v1253_v47, %v638_v18  ;;  %587 = vst.msk [vmem:[#allocation2 + $0x38] sm:$0xff] %vm19_vm0, %v538_v13 }
  0xca   :  { %838 = vst.msk [vmem:[%s1549_s3 + $0x14] sm:$0xf] %vm832_vm1, %v788_v16  ;;  %v825_v22 = vpack.c.bf16 %v776_v17, %v776_v17  ;;  %v102_v17 = vld [vmem:[#allocation2 + $0x108] sm:$0xff] }
  0xcb   :  { %v812_v26 = vpack.c.bf16 %v763_v19, %v763_v19  ;;  %850 = vst.msk [vmem:[%s1549_s3 + $0x44] sm:$0xf] %vm832_vm1, %v800_v20  ;;  %v740_v27 = vmax.f32 %v691_v21, 0.0 }
  0xcc   :  { %875 = vst.msk [vmem:[%s1549_s3 + $0xa8] sm:$0xf] %vm832_vm1, %v825_v22  ;;  %v650_v28 = vld [vmem:[#allocation2 + $0x90] sm:$0xff]  ;;  %v484_v29 = vpop.f32.mrf.mxu2 }
  0xcd   :  { %862 = vst.msk [vmem:[%s1549_s3 + $0x74] sm:$0xf] %vm832_vm1, %v812_v26  ;;  %v789_v31 = vpack.c.bf16 %v740_v27, %v740_v27  ;;  %v703_v32 = vadd.f32 %v1253_v47, %v650_v28  ;;  %v562_v33 = vadd.f32 %v484_v29, %v100_v23  ;;  %v675_v34 = vld [vmem:[#allocation2 + $0x158] sm:$0xff]  ;;  %v519_v36 = vpop.f32.mrf.mxu3  ;;  %v79_v22 = vld [vmem:[#allocation2 + $0x50] sm:$0xff] }
  0xce   :  { %v662_v37 = vld [vmem:[#allocation2 + $0xf0] sm:$0xff]  ;;  %v728_v38 = vadd.f32 %v1253_v47, %v675_v34  ;;  %599 = vst.msk [vmem:[#allocation2 + $0x98] sm:$0xff] %vm19_vm0, %v550_v24  ;;  %v427_v39 = vpop.f32.mrf.mxu0  ;;  %v576_v62 = vadd.f32 %v519_v36, %v114_v54 }
  0xcf   :  { %v715_v40 = vadd.f32 %v1253_v47, %v662_v37  ;;  %839 = vst.msk [vmem:[%s1549_s3 + $0x18] sm:$0xf] %vm832_vm1, %v789_v31  ;;  %v752_v41 = vmax.f32 %v703_v32, 0.0  ;;  %v539_v42 = vadd.f32 %v427_v39, %v77_v30  ;;  %v457_v44 = vpop.f32.mrf.mxu1  ;;  %v91_v26 = vld [vmem:[#allocation2 + $0xb0] sm:$0xff]  ;;  %v116_v31 = vld [vmem:[#allocation2 + $0x178] sm:$0xff] }
  0xd0   :  { %611 = vst.msk [vmem:[#allocation2 + $0xf8] sm:$0xff] %vm19_vm0, %v562_v33  ;;  %v777_v45 = vmax.f32 %v728_v38, 0.0  ;;  %v639_v46 = vld [vmem:[#allocation2 + $0x38] sm:$0xff]  ;;  %v551_v53 = vadd.f32 %v457_v44, %v89_v43 }
  0xd1   :  { %v764_v48 = vmax.f32 %v715_v40, 0.0  ;;  %v801_v49 = vpack.c.bf16 %v752_v41, %v752_v41  ;;  %v692_v50 = vadd.f32 %v1253_v47, %v639_v46  ;;  %624 = vst.msk [vmem:[#allocation2 + $0x160] sm:$0xff] %vm19_vm0, %v575_v35 }
  0xd2   :  { %v826_v51 = vpack.c.bf16 %v777_v45, %v777_v45  ;;  %588 = vst.msk [vmem:[#allocation2 + $0x40] sm:$0xff] %vm19_vm0, %v539_v42 }
  0xd3   :  { %v813_v55 = vpack.c.bf16 %v764_v48, %v764_v48  ;;  %851 = vst.msk [vmem:[%s1549_s3 + $0x48] sm:$0xf] %vm832_vm1, %v801_v49  ;;  %v741_v56 = vmax.f32 %v692_v50, 0.0  ;;  %v103_v49 = vld [vmem:[#allocation2 + $0x110] sm:$0xff] }
  0xd4   :  { %876 = vst.msk [vmem:[%s1549_s3 + $0xac] sm:$0xf] %vm832_vm1, %v826_v51  ;;  %v487_v57 = vpop.f32.mrf.mxu2 }
  0xd5   :  { %863 = vst.msk [vmem:[%s1549_s3 + $0x78] sm:$0xf] %vm832_vm1, %v813_v55  ;;  %v790_v59 = vpack.c.bf16 %v741_v56, %v741_v56  ;;  %v651_v60 = vld [vmem:[#allocation2 + $0x98] sm:$0xff]  ;;  %v563_v61 = vadd.f32 %v487_v57, %v101_v52  ;;  %v522_v0 = vpop.f32.mrf.mxu3 }
  0xd6   :  { %v704_v1 = vadd.f32 %v1253_v47, %v651_v60  ;;  %600 = vst.msk [vmem:[#allocation2 + $0xa0] sm:$0xff] %vm19_vm0, %v551_v53  ;;  %v429_v2 = vpop.f32.mrf.mxu0  ;;  %v577_v13 = vadd.f32 %v522_v0, %v115_v3  ;;  %v80_v57 = vld [vmem:[#allocation2 + $0x58] sm:$0xff] }
  0xd7   :  { %v663_v4 = vld [vmem:[#allocation2 + $0xf8] sm:$0xff]  ;;  %840 = vst.msk [vmem:[%s1549_s3 + $0x1c] sm:$0xf] %vm832_vm1, %v790_v59  ;;  %v540_v5 = vadd.f32 %v429_v2, %v78_v58  ;;  %v459_v6 = vpop.f32.mrf.mxu1  ;;  %v117_v2 = vld [vmem:[#allocation2 + $0x180] sm:$0xff] }
  0xd8   :  { %v716_v7 = vadd.f32 %v1253_v47, %v663_v4  ;;  %v753_v8 = vmax.f32 %v704_v1, 0.0  ;;  %612 = vst.msk [vmem:[#allocation2 + $0x100] sm:$0xff] %vm19_vm0, %v563_v61  ;;  %v676_v9 = vld [vmem:[#allocation2 + $0x160] sm:$0xff]  ;;  %v552_v10 = vadd.f32 %v459_v6, %v90_v63 }
  0xd9   :  { %v729_v11 = vadd.f32 %v1253_v47, %v676_v9  ;;  %v640_v12 = vld [vmem:[#allocation2 + $0x40] sm:$0xff]  ;;  %625 = vst.msk [vmem:[#allocation2 + $0x168] sm:$0xff] %vm19_vm0, %v576_v62  ;;  %v92_v62 = vld [vmem:[#allocation2 + $0xb8] sm:$0xff] }
  0xda   :  { %v765_v14 = vmax.f32 %v716_v7, 0.0  ;;  %v802_v15 = vpack.c.bf16 %v753_v8, %v753_v8  ;;  %v693_v16 = vadd.f32 %v1253_v47, %v640_v12  ;;  %589 = vst.msk [vmem:[#allocation2 + $0x48] sm:$0xff] %vm19_vm0, %v540_v5 }
  0xdb   :  { %v778_v18 = vmax.f32 %v729_v11, 0.0  ;;  %601 = vst.msk [vmem:[#allocation2 + $0xa8] sm:$0xff] %vm19_vm0, %v552_v10 }
  0xdc   :  { %v814_v19 = vpack.c.bf16 %v765_v14, %v765_v14  ;;  %852 = vst.msk [vmem:[%s1549_s3 + $0x4c] sm:$0xf] %vm832_vm1, %v802_v15  ;;  %v742_v20 = vmax.f32 %v693_v16, 0.0  ;;  %v489_v21 = vpop.f32.mrf.mxu2  ;;  %v104_v14 = vld [vmem:[#allocation2 + $0x118] sm:$0xff] }
  0xdd   :  { %v827_v23 = vpack.c.bf16 %v778_v18, %v778_v18  ;;  %v652_v24 = vld [vmem:[#allocation2 + $0xa0] sm:$0xff]  ;;  %v564_v25 = vadd.f32 %v489_v21, %v102_v17  ;;  %626 = vst.msk [vmem:[#allocation2 + $0x170] sm:$0xff] %vm19_vm0, %v577_v13  ;;  %v524_v27 = vpop.f32.mrf.mxu3 }
  0xde   :  { %864 = vst.msk [vmem:[%s1549_s3 + $0x7c] sm:$0xf] %vm832_vm1, %v814_v19  ;;  %v791_v28 = vpack.c.bf16 %v742_v20, %v742_v20  ;;  %v705_v29 = vadd.f32 %v1253_v47, %v652_v24  ;;  %v432_v30 = vpop.f32.mrf.mxu0  ;;  %v578_v41 = vadd.f32 %v524_v27, %v116_v31 }
  0xdf   :  { %v664_v32 = vld [vmem:[#allocation2 + $0x100] sm:$0xff]  ;;  %877 = vst.msk [vmem:[%s1549_s3 + $0xb0] sm:$0xf] %vm832_vm1, %v827_v23  ;;  %v541_v33 = vadd.f32 %v432_v30, %v79_v22  ;;  %v462_v34 = vpop.f32.mrf.mxu1 }
  0xe0   :  { %v717_v35 = vadd.f32 %v1253_v47, %v664_v32  ;;  %841 = vst.msk [vmem:[%s1549_s3 + $0x20] sm:$0xf] %vm832_vm1, %v791_v28  ;;  %v754_v36 = vmax.f32 %v705_v29, 0.0  ;;  %v677_v37 = vld [vmem:[#allocation2 + $0x168] sm:$0xff]  ;;  %v553_v38 = vadd.f32 %v462_v34, %v91_v26  ;;  %v105_v29 = vld [vmem:[#allocation2 + $0x120] sm:$0xff] }
  0xe1   :  { %613 = vst.msk [vmem:[#allocation2 + $0x108] sm:$0xff] %vm19_vm0, %v564_v25  ;;  %v730_v39 = vadd.f32 %v1253_v47, %v677_v37  ;;  %v641_v40 = vld [vmem:[#allocation2 + $0x48] sm:$0xff] }
  0xe2   :  { %v766_v42 = vmax.f32 %v717_v35, 0.0  ;;  %v803_v43 = vpack.c.bf16 %v754_v36, %v754_v36  ;;  %v694_v44 = vadd.f32 %v1253_v47, %v641_v40  ;;  %v653_v45 = vld [vmem:[#allocation2 + $0xa8] sm:$0xff]  ;;  %590 = vst.msk [vmem:[#allocation2 + $0x50] sm:$0xff] %vm19_vm0, %v541_v33 }
  0xe3   :  { %v779_v46 = vmax.f32 %v730_v39, 0.0  ;;  %v706_v48 = vadd.f32 %v1253_v47, %v653_v45  ;;  %602 = vst.msk [vmem:[#allocation2 + $0xb0] sm:$0xff] %vm19_vm0, %v553_v38 }
  0xe4   :  { %v815_v50 = vpack.c.bf16 %v766_v42, %v766_v42  ;;  %853 = vst.msk [vmem:[%s1549_s3 + $0x50] sm:$0xf] %vm832_vm1, %v803_v43  ;;  %v743_v51 = vmax.f32 %v694_v44, 0.0  ;;  %v492_v52 = vpop.f32.mrf.mxu2  ;;  %v678_v53 = vld [vmem:[#allocation2 + $0x170] sm:$0xff] }
  0xe5   :  { %v828_v54 = vpack.c.bf16 %v779_v46, %v779_v46  ;;  %v755_v55 = vmax.f32 %v706_v48, 0.0  ;;  %v731_v56 = vadd.f32 %v1253_v47, %v678_v53  ;;  %627 = vst.msk [vmem:[#allocation2 + $0x178] sm:$0xff] %vm19_vm0, %v578_v41  ;;  %v527_v58 = vpop.f32.mrf.mxu3  ;;  %v565_v60 = vadd.f32 %v492_v52, %v103_v49  ;;  %v106_v49 = vld [vmem:[#allocation2 + $0x128] sm:$0xff] }
  0xe6   :  { %865 = vst.msk [vmem:[%s1549_s3 + $0x80] sm:$0xf] %vm832_vm1, %v815_v50  ;;  %v792_v59 = vpack.c.bf16 %v743_v51, %v743_v51  ;;  %v434_v61 = vpop.f32.mrf.mxu0  ;;  %v579_v11 = vadd.f32 %v527_v58, %v117_v2 }
  0xe7   :  { %878 = vst.msk [vmem:[%s1549_s3 + $0xb4] sm:$0xf] %vm832_vm1, %v828_v54  ;;  %v804_v63 = vpack.c.bf16 %v755_v55, %v755_v55  ;;  %v780_v0 = vmax.f32 %v731_v56, 0.0  ;;  %v464_v1 = vpop.f32.mrf.mxu1  ;;  %v542_v4 = vadd.f32 %v434_v61, %v80_v57 }
  0xe8   :  { %v665_v3 = vld [vmem:[#allocation2 + $0x108] sm:$0xff]  ;;  %842 = vst.msk [vmem:[%s1549_s3 + $0x24] sm:$0xf] %vm832_vm1, %v792_v59  ;;  %v554_v8 = vadd.f32 %v464_v1, %v92_v62 }
  0xe9   :  { %v718_v5 = vadd.f32 %v1253_v47, %v665_v3  ;;  %854 = vst.msk [vmem:[%s1549_s3 + $0x54] sm:$0xf] %vm832_vm1, %v804_v63  ;;  %v829_v6 = vpack.c.bf16 %v780_v0, %v780_v0  ;;  %v642_v7 = vld [vmem:[#allocation2 + $0x50] sm:$0xff] }
  0xea   :  { %614 = vst.msk [vmem:[#allocation2 + $0x110] sm:$0xff] %vm19_vm0, %v565_v60  ;;  %v695_v9 = vadd.f32 %v1253_v47, %v642_v7  ;;  %v654_v10 = vld [vmem:[#allocation2 + $0xb0] sm:$0xff] }
  0xeb   :  { %v767_v12 = vmax.f32 %v718_v5, 0.0  ;;  %879 = vst.msk [vmem:[%s1549_s3 + $0xb8] sm:$0xf] %vm832_vm1, %v829_v6  ;;  %v707_v13 = vadd.f32 %v1253_v47, %v654_v10 }
  0xec   :  { %v744_v15 = vmax.f32 %v695_v9, 0.0  ;;  %v494_v16 = vpop.f32.mrf.mxu2  ;;  %v679_v17 = vld [vmem:[#allocation2 + $0x178] sm:$0xff]  ;;  %591 = vst.msk [vmem:[#allocation2 + $0x58] sm:$0xff] %vm19_vm0, %v542_v4 }
  0xed   :  { %v816_v18 = vpack.c.bf16 %v767_v12, %v767_v12  ;;  %v756_v19 = vmax.f32 %v707_v13, 0.0  ;;  %v732_v20 = vadd.f32 %v1253_v47, %v679_v17  ;;  %603 = vst.msk [vmem:[#allocation2 + $0xb8] sm:$0xff] %vm19_vm0, %v554_v8  ;;  %v529_v21 = vpop.f32.mrf.mxu3  ;;  %v566_v23 = vadd.f32 %v494_v16, %v104_v14 }
  0xee   :  { %v793_v22 = vpack.c.bf16 %v744_v15, %v744_v15  ;;  %628 = vst.msk [vmem:[#allocation2 + $0x180] sm:$0xff] %vm19_vm0, %v579_v11 }
  0xef   :  { %866 = vst.msk [vmem:[%s1549_s3 + $0x84] sm:$0xf] %vm832_vm1, %v816_v18  ;;  %v805_v24 = vpack.c.bf16 %v756_v19, %v756_v19  ;;  %v781_v25 = vmax.f32 %v732_v20, 0.0 }
  0xf0   :  { %843 = vst.msk [vmem:[%s1549_s3 + $0x28] sm:$0xf] %vm832_vm1, %v793_v22 }
  0xf1   :  { %v666_v26 = vld [vmem:[#allocation2 + $0x110] sm:$0xff]  ;;  %855 = vst.msk [vmem:[%s1549_s3 + $0x58] sm:$0xf] %vm832_vm1, %v805_v24  ;;  %v830_v27 = vpack.c.bf16 %v781_v25, %v781_v25 }
  0xf2   :  { %v719_v28 = vadd.f32 %v1253_v47, %v666_v26  ;;  %615 = vst.msk [vmem:[#allocation2 + $0x118] sm:$0xff] %vm19_vm0, %v566_v23 }
  0xf3   :  { %880 = vst.msk [vmem:[%s1549_s3 + $0xbc] sm:$0xf] %vm832_vm1, %v830_v27  ;;  %v643_v30 = vld [vmem:[#allocation2 + $0x58] sm:$0xff] }
  0xf4   :  { %v768_v31 = vmax.f32 %v719_v28, 0.0  ;;  %v696_v32 = vadd.f32 %v1253_v47, %v643_v30  ;;  %v655_v33 = vld [vmem:[#allocation2 + $0xb8] sm:$0xff]  ;;  %v497_v34 = vpop.f32.mrf.mxu2 }
  0xf5   :  { %v708_v35 = vadd.f32 %v1253_v47, %v655_v33  ;;  %v567_v36 = vadd.f32 %v497_v34, %v105_v29  ;;  %v680_v37 = vld [vmem:[#allocation2 + $0x180] sm:$0xff] }
  0xf6   :  { %v817_v38 = vpack.c.bf16 %v768_v31, %v768_v31  ;;  %v745_v39 = vmax.f32 %v696_v32, 0.0  ;;  %v733_v40 = vadd.f32 %v1253_v47, %v680_v37 }
  0xf7   :  { %v757_v41 = vmax.f32 %v708_v35, 0.0  ;;  %616 = vst.msk [vmem:[#allocation2 + $0x120] sm:$0xff] %vm19_vm0, %v567_v36 }
  0xf8   :  { %867 = vst.msk [vmem:[%s1549_s3 + $0x88] sm:$0xf] %vm832_vm1, %v817_v38  ;;  %v794_v42 = vpack.c.bf16 %v745_v39, %v745_v39  ;;  %v782_v43 = vmax.f32 %v733_v40, 0.0 }
  0xf9   :  { %v667_v44 = vld [vmem:[#allocation2 + $0x118] sm:$0xff]  ;;  %v806_v45 = vpack.c.bf16 %v757_v41, %v757_v41 }
  0xfa   :  { %v720_v46 = vadd.f32 %v1253_v47, %v667_v44  ;;  %844 = vst.msk [vmem:[%s1549_s3 + $0x2c] sm:$0xf] %vm832_vm1, %v794_v42  ;;  %v831_v48 = vpack.c.bf16 %v782_v43, %v782_v43 }
  0xfb   :  { %856 = vst.msk [vmem:[%s1549_s3 + $0x5c] sm:$0xf] %vm832_vm1, %v806_v45 }
  0xfc   :  { %v769_v50 = vmax.f32 %v720_v46, 0.0  ;;  %881 = vst.msk [vmem:[%s1549_s3 + $0xc0] sm:$0xf] %vm832_vm1, %v831_v48  ;;  %v499_v51 = vpop.f32.mrf.mxu2 }
  0xfd   :  { %v568_v52 = vadd.f32 %v499_v51, %v106_v49 }
  0xfe   :  { %v818_v53 = vpack.c.bf16 %v769_v50, %v769_v50  ;;  %v668_v54 = vld [vmem:[#allocation2 + $0x120] sm:$0xff] }
  0xff   :  { %v721_v55 = vadd.f32 %v1253_v47, %v668_v54  ;;  %617 = vst.msk [vmem:[#allocation2 + $0x128] sm:$0xff] %vm19_vm0, %v568_v52 }
 0x100   :  { %868 = vst.msk [vmem:[%s1549_s3 + $0x8c] sm:$0xf] %vm832_vm1, %v818_v53 }
 0x101   :  { %v770_v56 = vmax.f32 %v721_v55, 0.0 }
 0x103   :  { %v819_v57 = vpack.c.bf16 %v770_v56, %v770_v56 }
 0x105   :  { %869 = vst.msk [vmem:[%s1549_s3 + $0x90] sm:$0xf] %vm832_vm1, %v819_v57 }
 0x106   :  { %v669_v58 = vld [vmem:[#allocation2 + $0x128] sm:$0xff] }
 0x107   :  { %v722_v59 = vadd.f32 %v1253_v47, %v669_v58 }
 0x109   :  { %v771_v60 = vmax.f32 %v722_v59, 0.0 }
 0x10b   :  { %v820_v61 = vpack.c.bf16 %v771_v60, %v771_v60 }
 0x10d   :  { %870 = vst.msk [vmem:[%s1549_s3 + $0x94] sm:$0xf] %vm832_vm1, %v820_v61 }

// kernel: snnl_forward.5
= control target key start
LH: loop header
LB: loop body
LE: loop exit
PB: predicated region body
PF: predicated region fallthrough
CT: control target
= control target key end

     0   :  { %s1734_s12 = smov 0   ;;  %s1736_s13 = smov 0   ;;  %s1996_s0 = inlined_call_operand.vmem [shape: bf16[128,2560], index: 0, kind: input, shape index: {}]   ;;  %s1997_s1 = inlined_call_operand.vmem [shape: bf16[2560,128], index: 1, kind: input, shape index: {}]   ;;  %s1998_s2 = inlined_call_operand.vmem [shape: f32[1,128], index: 2, kind: input, shape index: {}]   ;;  %s1999_s3 = inlined_call_operand.vmem [shape: bf16[128,128], index: 3, kind: output, shape index: {}]  }
   0x1   :  { %s1738_s14 = smov 0   ;;  %s1740_s15 = smov 0  }
   0x2   :  { %s1742_s16 = smov 0  }
   0x3 LB: > { %s25_s17 = sadd.s32 1, %s1707_s15  ;;  %p48_p1 = scmp.ne.s32.totalorder %s1699_s13, %s1695_s12  ;;  %s1711_s16 = sphi %s1742_s16, %s13_s16   ;;  %s1707_s15 = sphi %s1740_s15, %s2003_s15   ;;  %s1703_s14 = sphi %s1738_s14, %s2002_s14   ;;  %s1699_s13 = sphi %s1736_s13, %s2001_s13   ;;  %s1695_s12 = sphi %s1734_s12, %s2000_s12  }
   0x4   : > { %p26_p0 = scmp.ge.s32.totalorder %s25_s17, 5  ;;  %p49_p2 = scmp.eq.s32.totalorder %s1711_s16, 0 }
   0x5   : > { %s41_s19 = sadd.s32 1, %s1699_s13  ;;  %p1249_p5 = scmp.ge.s32.totalorder %s1711_s16, 5 }
   0x6   : > { %s2005_s17 = smov (%p26_p0, %s25_s17), 0  ;;  %p50_p3 = por %p49_p2, %p48_p1 }
   0x7   : > { %s37_s18 = ssub.s32 %s1707_s15, %s2005_s17  ;;  %162 = sbr.rel (%p1249_p5) target bundleno = 48 (0x30), region = 20 }
   0x8   : > { %p39_p4 = scmp.eq.s32.totalorder %s37_s18, 0 }
   0xa   : > { %s1769_s20 = scalar_select %p39_p4, %s1699_s13, %s41_s19  }
   0xc   : > { %165 = sbr.rel (!%p50_p3) target bundleno = 48 (0x30), region = 24  ;;  %s167_s21 = sand.u32 (%p50_p3), 1, %s1699_s13  }
   0xd   : > { %s1519_s22 = sshll.u32 (%p50_p3), %s1707_s15, 4  ;;  %s1250_s23 = sshll.u32 (%p50_p3), %s167_s21, 8 }
   0xe   : > { %s1777_s26 = scalar_lea.vmem (%p50_p3), %s1996_s0, %s1519_s22  ;;  %s1782_s27 = scalar_lea.vmem (%p50_p3), [#allocation3], %s1250_s23 }
   0xf   : > { %v188_v0 = vld [vmem:[%s1777_s26] sm:$0xff] (%p50_p3)  ;;  %v190_v1 = vld [vmem:[%s1777_s26 + $0x8] sm:$0xff] (%p50_p3)  ;;  %v192_v2 = vld [vmem:[%s1777_s26 + $0x50] sm:$0xff] (%p50_p3) }
  0x10   : > { %189 = vst [vmem:[%s1782_s27] sm:$0xff] (%p50_p3), %v188_v0  ;;  %v194_v3 = vld [vmem:[%s1777_s26 + $0x58] sm:$0xff] (%p50_p3)  ;;  %v196_v4 = vld [vmem:[%s1777_s26 + $0xa0] sm:$0xff] (%p50_p3)  ;;  %v198_v5 = vld [vmem:[%s1777_s26 + $0xa8] sm:$0xff] (%p50_p3) }
  0x11   : > { %191 = vst [vmem:[%s1782_s27 + $0x8] sm:$0xff] %v190_v1  ;;  %v200_v6 = vld [vmem:[%s1777_s26 + $0xf0] sm:$0xff]  ;;  %v202_v7 = vld [vmem:[%s1777_s26 + $0xf8] sm:$0xff]  ;;  %v204_v8 = vld [vmem:[%s1777_s26 + $0x140] sm:$0xff] }
  0x12   : > { %193 = vst [vmem:[%s1782_s27 + $0x10] sm:$0xff] %v192_v2  ;;  %v206_v9 = vld [vmem:[%s1777_s26 + $0x148] sm:$0xff]  ;;  %v208_v10 = vld [vmem:[%s1777_s26 + $0x190] sm:$0xff]  ;;  %v210_v11 = vld [vmem:[%s1777_s26 + $0x198] sm:$0xff] }
  0x13   : > { %195 = vst [vmem:[%s1782_s27 + $0x18] sm:$0xff] %v194_v3  ;;  %v212_v12 = vld [vmem:[%s1777_s26 + $0x1e0] sm:$0xff]  ;;  %v214_v13 = vld [vmem:[%s1777_s26 + $0x1e8] sm:$0xff]  ;;  %v216_v14 = vld [vmem:[%s1777_s26 + $0x230] sm:$0xff] }
  0x14   : > { %197 = vst [vmem:[%s1782_s27 + $0x20] sm:$0xff] %v196_v4  ;;  %v218_v15 = vld [vmem:[%s1777_s26 + $0x238] sm:$0xff]  ;;  %v220_v16 = vld [vmem:[%s1777_s26 + $0x280] sm:$0xff]  ;;  %v222_v17 = vld [vmem:[%s1777_s26 + $0x288] sm:$0xff] }
  0x15   : > { %199 = vst [vmem:[%s1782_s27 + $0x28] sm:$0xff] %v198_v5  ;;  %v224_v18 = vld [vmem:[%s1777_s26 + $0x2d0] sm:$0xff]  ;;  %v226_v19 = vld [vmem:[%s1777_s26 + $0x2d8] sm:$0xff]  ;;  %v228_v20 = vld [vmem:[%s1777_s26 + $0x320] sm:$0xff] }
  0x16   : > { %201 = vst [vmem:[%s1782_s27 + $0x30] sm:$0xff] %v200_v6  ;;  %v230_v21 = vld [vmem:[%s1777_s26 + $0x328] sm:$0xff]  ;;  %v232_v22 = vld [vmem:[%s1777_s26 + $0x370] sm:$0xff]  ;;  %v234_v23 = vld [vmem:[%s1777_s26 + $0x378] sm:$0xff] }
  0x17   : > { %203 = vst [vmem:[%s1782_s27 + $0x38] sm:$0xff] %v202_v7  ;;  %v236_v24 = vld [vmem:[%s1777_s26 + $0x3c0] sm:$0xff]  ;;  %v238_v25 = vld [vmem:[%s1777_s26 + $0x3c8] sm:$0xff]  ;;  %v240_v26 = vld [vmem:[%s1777_s26 + $0x410] sm:$0xff] }
  0x18   : > { %205 = vst [vmem:[%s1782_s27 + $0x40] sm:$0xff] %v204_v8  ;;  %v242_v27 = vld [vmem:[%s1777_s26 + $0x418] sm:$0xff]  ;;  %v244_v28 = vld [vmem:[%s1777_s26 + $0x460] sm:$0xff]  ;;  %v246_v29 = vld [vmem:[%s1777_s26 + $0x468] sm:$0xff] }
  0x19   : > { %207 = vst [vmem:[%s1782_s27 + $0x48] sm:$0xff] %v206_v9  ;;  %v248_v30 = vld [vmem:[%s1777_s26 + $0x4b0] sm:$0xff]  ;;  %v250_v31 = vld [vmem:[%s1777_s26 + $0x4b8] sm:$0xff] }
  0x1a   : > { %209 = vst [vmem:[%s1782_s27 + $0x50] sm:$0xff] %v208_v10 }
  0x1b   : > { %211 = vst [vmem:[%s1782_s27 + $0x58] sm:$0xff] %v210_v11 }
  0x1c   : > { %213 = vst [vmem:[%s1782_s27 + $0x60] sm:$0xff] %v212_v12 }
  0x1d   : > { %215 = vst [vmem:[%s1782_s27 + $0x68] sm:$0xff] %v214_v13 }
  0x1e   : > { %217 = vst [vmem:[%s1782_s27 + $0x70] sm:$0xff] %v216_v14 }
  0x1f   : > { %219 = vst [vmem:[%s1782_s27 + $0x78] sm:$0xff] %v218_v15 }
  0x20   : > { %221 = vst [vmem:[%s1782_s27 + $0x80] sm:$0xff] %v220_v16 }
  0x21   : > { %223 = vst [vmem:[%s1782_s27 + $0x88] sm:$0xff] %v222_v17 }
  0x22   : > { %225 = vst [vmem:[%s1782_s27 + $0x90] sm:$0xff] %v224_v18 }
  0x23   : > { %227 = vst [vmem:[%s1782_s27 + $0x98] sm:$0xff] %v226_v19 }
  0x24   : > { %229 = vst [vmem:[%s1782_s27 + $0xa0] sm:$0xff] %v228_v20 }
  0x25   : > { %231 = vst [vmem:[%s1782_s27 + $0xa8] sm:$0xff] %v230_v21 }
  0x26   : > { %233 = vst [vmem:[%s1782_s27 + $0xb0] sm:$0xff] %v232_v22 }
  0x27   : > { %235 = vst [vmem:[%s1782_s27 + $0xb8] sm:$0xff] %v234_v23 }
  0x28   : > { %237 = vst [vmem:[%s1782_s27 + $0xc0] sm:$0xff] %v236_v24 }
  0x29   : > { %239 = vst [vmem:[%s1782_s27 + $0xc8] sm:$0xff] %v238_v25 }
  0x2a   : > { %241 = vst [vmem:[%s1782_s27 + $0xd0] sm:$0xff] %v240_v26 }
  0x2b   : > { %243 = vst [vmem:[%s1782_s27 + $0xd8] sm:$0xff] %v242_v27 }
  0x2c   : > { %245 = vst [vmem:[%s1782_s27 + $0xe0] sm:$0xff] %v244_v28 }
  0x2d   : > { %247 = vst [vmem:[%s1782_s27 + $0xe8] sm:$0xff] %v246_v29 }
  0x2e   : > { %249 = vst [vmem:[%s1782_s27 + $0xf0] sm:$0xff] %v248_v30 }
  0x2f   : > { %251 = vst [vmem:[%s1782_s27 + $0xf8] sm:$0xff] %v250_v31 }
  0x30 PF: > { %p1253_p6 = scmp.ge.s32.totalorder %s1711_s16, 1  ;;  %p268_p7 = scmp.lt.s32.totalorder %s1711_s16, 6 }
  0x32   : > { %p269_p8 = pnand %p1253_p6, %p268_p7 }
  0x33   : > { %s275_s28 = sand.u32 (!%p269_p8), 1, %s1695_s12   ;;  %s1255_s29 = sshll.u32 (!%p269_p8), %s1703_s14, 6 }
  0x34   : > { %272 = sbr.rel (%p269_p8) target bundleno = 388 (0x184), region = 51  ;;  %s1254_s30 = sshll.u32 (!%p269_p8), %s275_s28, 8 }
  0x35   : > { %p315_p9 = scmp.lt.s32.totalorder (!%p269_p8), %s1255_s29, 319  ;;  %s1854_s8 = scalar_lea.vmem (!%p269_p8), [#allocation3], %s1254_s30 }
  0x36   : > { %p1257_p10 = scmp.ne.s32.totalorder (!%p269_p8), %s1703_s14, 0 }
  0x39   : > { %s2007_s29 = smov (!%p315_p9, %s1255_s29), 319  ;;  %338 = sbr.rel (%p1257_p10) target bundleno = 79 (0x4f), region = 59 }
  0x3a   : > { %s1256_s4 = sshll.u32 %s2007_s29, 2 }
  0x3b   : > { %s1852_s7 = scalar_lea.vmem %s1997_s1, %s1256_s4 }
  0x3e   : > { %v1713_v32 = vmov 0.0  }
  0x3f   : > { %339 = vst [vmem:[#allocation2 + $0x30] sm:$0xff] %v1713_v32 }
  0x40   : > { %340 = vst [vmem:[#allocation2] sm:$0xff] %v1713_v32 }
  0x41   : > { %341 = vst [vmem:[#allocation2 + $0x58] sm:$0xff] %v1713_v32 }
  0x42   : > { %342 = vst [vmem:[#allocation2 + $0x18] sm:$0xff] %v1713_v32 }
  0x43   : > { %343 = vst [vmem:[#allocation2 + $0x50] sm:$0xff] %v1713_v32 }
  0x44   : > { %344 = vst [vmem:[#allocation2 + $0x68] sm:$0xff] %v1713_v32 }
  0x45   : > { %345 = vst [vmem:[#allocation2 + $0x8] sm:$0xff] %v1713_v32 }
  0x46   : > { %346 = vst [vmem:[#allocation2 + $0x48] sm:$0xff] %v1713_v32 }
  0x47   : > { %347 = vst [vmem:[#allocation2 + $0x40] sm:$0xff] %v1713_v32 }
  0x48   : > { %348 = vst [vmem:[#allocation2 + $0x20] sm:$0xff] %v1713_v32 }
  0x49   : > { %349 = vst [vmem:[#allocation2 + $0x10] sm:$0xff] %v1713_v32 }
  0x4a   : > { %350 = vst [vmem:[#allocation2 + $0x38] sm:$0xff] %v1713_v32 }
  0x4b   : > { %351 = vst [vmem:[#allocation2 + $0x60] sm:$0xff] %v1713_v32 }
  0x4c   : > { %352 = vst [vmem:[#allocation2 + $0x70] sm:$0xff] %v1713_v32 }
  0x4d   : > { %353 = vst [vmem:[#allocation2 + $0x78] sm:$0xff] %v1713_v32 }
  0x4e   : > { %354 = vst [vmem:[#allocation2 + $0x28] sm:$0xff] %v1713_v32 }
  0x4f PF: > { %v1559_v33 = vld [vmem:[%s1852_s7 + $0x38] sm:$0xff]  ;;  %v1558_v37 = vld [vmem:[%s1852_s7 + $0x30] sm:$0xff]  ;;  %v1557_v41 = vld [vmem:[%s1852_s7 + $0x28] sm:$0xff]  ;;  %p1514_p11 = scmp.ne.s32.totalorder %s1703_s14, 4 }
  0x50   : > { %v1567_v34 = vld [vmem:[%s1852_s7 + $0x78] sm:$0xff]  ;;  %819 = vmatpush.bf16.msra.mxu0 %v1559_v33  ;;  %v1566_v38 = vld [vmem:[%s1852_s7 + $0x70] sm:$0xff]  ;;  %v1565_v42 = vld [vmem:[%s1852_s7 + $0x68] sm:$0xff] }
  0x51   : > { %v1575_v35 = vld [vmem:[%s1852_s7 + $0xb8] sm:$0xff]  ;;  %868 = vmatpush.bf16.msra.mxu1 %v1567_v34  ;;  %v1574_v39 = vld [vmem:[%s1852_s7 + $0xb0] sm:$0xff]  ;;  %v1573_v43 = vld [vmem:[%s1852_s7 + $0xa8] sm:$0xff] }
  0x52   : > { %v1583_v36 = vld [vmem:[%s1852_s7 + $0xf8] sm:$0xff]  ;;  %917 = vmatpush.bf16.msra.mxu2 %v1575_v35  ;;  %v1582_v40 = vld [vmem:[%s1852_s7 + $0xf0] sm:$0xff]  ;;  %v1581_v44 = vld [vmem:[%s1852_s7 + $0xe8] sm:$0xff] }
  0x53   : > { %966 = vmatpush.bf16.msra.mxu3 %v1583_v36  ;;  %v1556_v45 = vld [vmem:[%s1852_s7 + $0x20] sm:$0xff]  ;;  %v1555_v49 = vld [vmem:[%s1852_s7 + $0x18] sm:$0xff]  ;;  %v1554_v53 = vld [vmem:[%s1852_s7 + $0x10] sm:$0xff] }
  0x54   : > { %820 = vmatpush.bf16.msra.mxu0 %v1558_v37  ;;  %v1564_v46 = vld [vmem:[%s1852_s7 + $0x60] sm:$0xff]  ;;  %v1563_v50 = vld [vmem:[%s1852_s7 + $0x58] sm:$0xff]  ;;  %v1562_v54 = vld [vmem:[%s1852_s7 + $0x50] sm:$0xff] }
  0x55   : > { %869 = vmatpush.bf16.msra.mxu1 %v1566_v38  ;;  %v1572_v47 = vld [vmem:[%s1852_s7 + $0xa0] sm:$0xff]  ;;  %v1571_v51 = vld [vmem:[%s1852_s7 + $0x98] sm:$0xff]  ;;  %v1570_v55 = vld [vmem:[%s1852_s7 + $0x90] sm:$0xff] }
  0x56   : > { %918 = vmatpush.bf16.msra.mxu2 %v1574_v39  ;;  %v1580_v48 = vld [vmem:[%s1852_s7 + $0xe0] sm:$0xff]  ;;  %v1579_v52 = vld [vmem:[%s1852_s7 + $0xd8] sm:$0xff]  ;;  %v1578_v56 = vld [vmem:[%s1852_s7 + $0xd0] sm:$0xff] }
  0x57   : > { %967 = vmatpush.bf16.msra.mxu3 %v1582_v40  ;;  %v1553_v57 = vld [vmem:[%s1852_s7 + $0x8] sm:$0xff]  ;;  %v1552_v61 = vld [vmem:[%s1852_s7] sm:$0xff]  ;;  %v1522_v2 = vld [vmem:[%s1854_s8 + $0xc] sm:$0xf0] }
  0x58   : > { %821 = vmatpush.bf16.msra.mxu0 %v1557_v41  ;;  %v1561_v58 = vld [vmem:[%s1852_s7 + $0x48] sm:$0xff]  ;;  %v1560_v62 = vld [vmem:[%s1852_s7 + $0x40] sm:$0xff]  ;;  %v1262_v4 = vld [vmem:[%s1854_s8 + $0x10] sm:$0xf0] }
  0x59   : > { %870 = vmatpush.bf16.msra.mxu1 %v1565_v42  ;;  %v1569_v59 = vld [vmem:[%s1852_s7 + $0x88] sm:$0xff]  ;;  %v1568_v63 = vld [vmem:[%s1852_s7 + $0x80] sm:$0xff]  ;;  %v1523_v6 = vld [vmem:[%s1854_s8 + $0x14] sm:$0xf0] }
  0x5a   : > { %919 = vmatpush.bf16.msra.mxu2 %v1573_v43  ;;  %v1577_v60 = vld [vmem:[%s1852_s7 + $0xc8] sm:$0xff]  ;;  %v1576_v0 = vld [vmem:[%s1852_s7 + $0xc0] sm:$0xff]  ;;  %v1270_v8 = vld [vmem:[%s1854_s8 + $0x18] sm:$0xf0] }
  0x5b   : > { %968 = vmatpush.bf16.msra.mxu3 %v1581_v44  ;;  %v1260_v1 = vld [vmem:[%s1854_s8] sm:$0xf]  ;;  %v1520_v3 = vld [vmem:[%s1854_s8 + $0x4] sm:$0xf]  ;;  %v1268_v5 = vld [vmem:[%s1854_s8 + $0x8] sm:$0xf] }
  0x5c   : > { %822 = vmatpush.bf16.msra.mxu0 %v1556_v45  ;;  %v1521_v7 = vld [vmem:[%s1854_s8 + $0xc] sm:$0xf]  ;;  %v1261_v9 = vor.u32 %v1522_v2, %v1260_v1  ;;  %v1265_v10 = vor.u32 %v1520_v3, %v1262_v4  ;;  %v1269_v11 = vor.u32 %v1523_v6, %v1268_v5  ;;  %v1276_v13 = vld [vmem:[%s1854_s8 + $0x20] sm:$0xf]  ;;  %v1526_v14 = vld [vmem:[%s1854_s8 + $0x2c] sm:$0xf0] }
  0x5d   : > { %871 = vmatpush.bf16.msra.mxu1 %v1564_v46  ;;  %v1273_v12 = vor.u32 %v1521_v7, %v1270_v8  ;;  %v1524_v15 = vld [vmem:[%s1854_s8 + $0x24] sm:$0xf]  ;;  %v1278_v16 = vld [vmem:[%s1854_s8 + $0x30] sm:$0xf0]  ;;  %v1284_v17 = vld [vmem:[%s1854_s8 + $0x28] sm:$0xf]  ;;  %v1277_v21 = vor.u32 %v1526_v14, %v1276_v13 }
  0x5e   : > { %920 = vmatpush.bf16.msra.mxu2 %v1572_v47  ;;  %v1527_v18 = vld [vmem:[%s1854_s8 + $0x34] sm:$0xf0]  ;;  %v1525_v19 = vld [vmem:[%s1854_s8 + $0x2c] sm:$0xf]  ;;  %v1286_v20 = vld [vmem:[%s1854_s8 + $0x38] sm:$0xf0]  ;;  %v1281_v22 = vor.u32 %v1524_v15, %v1278_v16 }
  0x5f   : > { %969 = vmatpush.bf16.msra.mxu3 %v1580_v48  ;;  %v1285_v23 = vor.u32 %v1527_v18, %v1284_v17  ;;  %v1289_v24 = vor.u32 %v1525_v19, %v1286_v20  ;;  %v1292_v25 = vld [vmem:[%s1854_s8 + $0x40] sm:$0xf]  ;;  %v1530_v26 = vld [vmem:[%s1854_s8 + $0x4c] sm:$0xf0]  ;;  %v1528_v27 = vld [vmem:[%s1854_s8 + $0x44] sm:$0xf] }
  0x60   : > { %823 = vmatpush.bf16.msra.mxu0 %v1555_v49  ;;  %v1294_v28 = vld [vmem:[%s1854_s8 + $0x50] sm:$0xf0]  ;;  %v1300_v29 = vld [vmem:[%s1854_s8 + $0x48] sm:$0xf]  ;;  %v1531_v30 = vld [vmem:[%s1854_s8 + $0x54] sm:$0xf0]  ;;  %v1293_v33 = vor.u32 %v1530_v26, %v1292_v25 }
  0x61   : > { %872 = vmatpush.bf16.msra.mxu1 %v1563_v50  ;;  %v1529_v31 = vld [vmem:[%s1854_s8 + $0x4c] sm:$0xf]  ;;  %v1302_v32 = vld [vmem:[%s1854_s8 + $0x58] sm:$0xf0]  ;;  %v1297_v34 = vor.u32 %v1528_v27, %v1294_v28  ;;  %v1301_v35 = vor.u32 %v1531_v30, %v1300_v29  ;;  %v1308_v37 = vld [vmem:[%s1854_s8 + $0x60] sm:$0xf] }
  0x62   : > { %921 = vmatpush.bf16.msra.mxu2 %v1571_v51  ;;  %v1305_v36 = vor.u32 %v1529_v31, %v1302_v32  ;;  %v1534_v38 = vld [vmem:[%s1854_s8 + $0x6c] sm:$0xf0]  ;;  %v1532_v39 = vld [vmem:[%s1854_s8 + $0x64] sm:$0xf]  ;;  %v1310_v40 = vld [vmem:[%s1854_s8 + $0x70] sm:$0xf0] }
  0x63   : > { %970 = vmatpush.bf16.msra.mxu3 %v1579_v52  ;;  %v1316_v41 = vld [vmem:[%s1854_s8 + $0x68] sm:$0xf]  ;;  %v1535_v42 = vld [vmem:[%s1854_s8 + $0x74] sm:$0xf0]  ;;  %v1533_v43 = vld [vmem:[%s1854_s8 + $0x6c] sm:$0xf]  ;;  %v1309_v45 = vor.u32 %v1534_v38, %v1308_v37  ;;  %v1313_v46 = vor.u32 %v1532_v39, %v1310_v40 }
  0x64   : > { %824 = vmatpush.bf16.msra.mxu0 %v1554_v53  ;;  %v1318_v44 = vld [vmem:[%s1854_s8 + $0x78] sm:$0xf0]  ;;  %v1317_v47 = vor.u32 %v1535_v42, %v1316_v41  ;;  %v1324_v49 = vld [vmem:[%s1854_s8 + $0x80] sm:$0xf]  ;;  %v1538_v50 = vld [vmem:[%s1854_s8 + $0x8c] sm:$0xf0] }
  0x65   : > { %873 = vmatpush.bf16.msra.mxu1 %v1562_v54  ;;  %v1321_v48 = vor.u32 %v1533_v43, %v1318_v44  ;;  %v1536_v51 = vld [vmem:[%s1854_s8 + $0x84] sm:$0xf]  ;;  %v1326_v52 = vld [vmem:[%s1854_s8 + $0x90] sm:$0xf0]  ;;  %v1332_v53 = vld [vmem:[%s1854_s8 + $0x88] sm:$0xf] }
  0x66   : > { %922 = vmatpush.bf16.msra.mxu2 %v1570_v55  ;;  %v1539_v54 = vld [vmem:[%s1854_s8 + $0x94] sm:$0xf0]  ;;  %v1537_v55 = vld [vmem:[%s1854_s8 + $0x8c] sm:$0xf]  ;;  %v1348_v1 = vld [vmem:[%s1854_s8 + $0xa8] sm:$0xf] }
  0x67   : > { %971 = vmatpush.bf16.msra.mxu3 %v1578_v56  ;;  %v1334_v56 = vld [vmem:[%s1854_s8 + $0x98] sm:$0xf0]  ;;  %v1543_v2 = vld [vmem:[%s1854_s8 + $0xb4] sm:$0xf0]  ;;  %v1541_v3 = vld [vmem:[%s1854_s8 + $0xac] sm:$0xf] }
  0x68   : > { %825 = vmatpush.bf16.msra.mxu0 %v1553_v57  ;;  %v1325_v57 = vor.u32 %v1538_v50, %v1324_v49  ;;  %v1350_v4 = vld [vmem:[%s1854_s8 + $0xb8] sm:$0xf0]  ;;  %v1349_v7 = vor.u32 %v1543_v2, %v1348_v1  ;;  %v1364_v13 = vld [vmem:[%s1854_s8 + $0xc8] sm:$0xf]  ;;  %v1547_v14 = vld [vmem:[%s1854_s8 + $0xd4] sm:$0xf0] }
  0x69   : > { %874 = vmatpush.bf16.msra.mxu1 %v1561_v58  ;;  %v1329_v58 = vor.u32 %v1536_v51, %v1326_v52  ;;  %v1353_v8 = vor.u32 %v1541_v3, %v1350_v4  ;;  %v1545_v15 = vld [vmem:[%s1854_s8 + $0xcc] sm:$0xf]  ;;  %v1366_v16 = vld [vmem:[%s1854_s8 + $0xd8] sm:$0xf0]  ;;  %v1365_v19 = vor.u32 %v1547_v14, %v1364_v13  ;;  %v1380_v25 = vld [vmem:[%s1854_s8 + $0xe8] sm:$0xf] }
  0x6a   : > { %923 = vmatpush.bf16.msra.mxu2 %v1569_v59  ;;  %v1333_v59 = vor.u32 %v1539_v54, %v1332_v53  ;;  %v1369_v20 = vor.u32 %v1545_v15, %v1366_v16  ;;  %v1551_v26 = vld [vmem:[%s1854_s8 + $0xf4] sm:$0xf0]  ;;  %v1549_v27 = vld [vmem:[%s1854_s8 + $0xec] sm:$0xf]  ;;  %v1382_v28 = vld [vmem:[%s1854_s8 + $0xf8] sm:$0xf0] }
  0x6b   : > { %972 = vmatpush.bf16.msra.mxu3 %v1577_v60  ;;  %v1337_v60 = vor.u32 %v1537_v55, %v1334_v56  ;;  %v1381_v31 = vor.u32 %v1551_v26, %v1380_v25  ;;  %v1385_v32 = vor.u32 %v1549_v27, %v1382_v28  ;;  %v355_v41 = vld [vmem:[#allocation2 + $0x30] sm:$0xff]  ;;  %v356_v50 = vld [vmem:[#allocation2] sm:$0xff]  ;;  %v358_v4 = vld [vmem:[#allocation2 + $0x18] sm:$0xff] }
  0x6c   : > { %826 = vmatpush.bf16.msra.mxu0 %v1552_v61  ;;  %v1340_v61 = vld [vmem:[%s1854_s8 + $0xa0] sm:$0xf]  ;;  %v359_v13 = vld [vmem:[#allocation2 + $0x50] sm:$0xff] }
  0x6d   : > { %875 = vmatpush.bf16.msra.mxu1 %v1560_v62  ;;  %v1542_v62 = vld [vmem:[%s1854_s8 + $0xac] sm:$0xf0] }
  0x6e   : > { %924 = vmatpush.bf16.msra.mxu2 %v1568_v63  ;;  %v1540_v63 = vld [vmem:[%s1854_s8 + $0xa4] sm:$0xf]  ;;  %v1341_v5 = vor.u32 %v1542_v62, %v1340_v61 }
  0x6f   : > { %973 = vmatpush.bf16.msra.mxu3 %v1576_v0  ;;  %827 = vmatmul.bf16.vlgmr.msra.gmra.mxu0 %v1261_v9  ;;  %v1342_v0 = vld [vmem:[%s1854_s8 + $0xb0] sm:$0xf0]  ;;  %v1356_v9 = vld [vmem:[%s1854_s8 + $0xc0] sm:$0xf] }
  0x70   : > { %876 = vmatmul.bf16.vlgmr.msra.gmra.mxu1 %v1265_v10  ;;  %v1345_v6 = vor.u32 %v1540_v63, %v1342_v0  ;;  %v1546_v10 = vld [vmem:[%s1854_s8 + $0xcc] sm:$0xf0] }
  0x71   : > { %925 = vmatmul.bf16.vlgmr.msra.gmra.mxu2 %v1269_v11  ;;  %v1544_v11 = vld [vmem:[%s1854_s8 + $0xc4] sm:$0xf]  ;;  %v1357_v17 = vor.u32 %v1546_v10, %v1356_v9 }
  0x72   : > { %974 = vmatmul.bf16.vlgmr.msra.gmra.mxu3 %v1273_v12  ;;  %v1358_v12 = vld [vmem:[%s1854_s8 + $0xd0] sm:$0xf0] }
  0x73   : > { %v1361_v18 = vor.u32 %v1544_v11, %v1358_v12 }
  0x7f   : > { %832 = vmatmul.bf16.gmra.mxu0 %v1277_v21  ;;  %v1372_v21 = vld [vmem:[%s1854_s8 + $0xe0] sm:$0xf] }
  0x80   : > { %881 = vmatmul.bf16.gmra.mxu1 %v1281_v22  ;;  %v1550_v22 = vld [vmem:[%s1854_s8 + $0xec] sm:$0xf0] }
  0x81   : > { %930 = vmatmul.bf16.gmra.mxu2 %v1285_v23  ;;  %v1548_v23 = vld [vmem:[%s1854_s8 + $0xe4] sm:$0xf]  ;;  %v1373_v29 = vor.u32 %v1550_v22, %v1372_v21  ;;  %v360_v22 = vld [vmem:[#allocation2 + $0x68] sm:$0xff] }
  0x82   : > { %979 = vmatmul.bf16.gmra.mxu3 %v1289_v24  ;;  %v1374_v24 = vld [vmem:[%s1854_s8 + $0xf0] sm:$0xf0] }
  0x83   : > { %v1377_v30 = vor.u32 %v1548_v23, %v1374_v24 }
  0x8f   : > { %837 = vmatmul.bf16.gmra.mxu0 %v1293_v33 }
  0x90   : > { %886 = vmatmul.bf16.gmra.mxu1 %v1297_v34 }
  0x91   : > { %935 = vmatmul.bf16.gmra.mxu2 %v1301_v35 }
  0x92   : > { %984 = vmatmul.bf16.gmra.mxu3 %v1305_v36 }
  0x9f   : > { %842 = vmatmul.bf16.gmra.mxu0 %v1309_v45 }
  0xa0   : > { %891 = vmatmul.bf16.gmra.mxu1 %v1313_v46 }
  0xa1   : > { %940 = vmatmul.bf16.gmra.mxu2 %v1317_v47 }
  0xa2   : > { %989 = vmatmul.bf16.gmra.mxu3 %v1321_v48 }
  0xaf   : > { %847 = vmatmul.bf16.gmra.mxu0 %v1325_v57 }
  0xb0   : > { %896 = vmatmul.bf16.gmra.mxu1 %v1329_v58 }
  0xb1   : > { %945 = vmatmul.bf16.gmra.mxu2 %v1333_v59  ;;  %v357_v59 = vld [vmem:[#allocation2 + $0x58] sm:$0xff] }
  0xb2   : > { %994 = vmatmul.bf16.gmra.mxu3 %v1337_v60 }
  0xbf   : > { %852 = vmatmul.bf16.gmra.mxu0 %v1341_v5 }
  0xc0   : > { %901 = vmatmul.bf16.gmra.mxu1 %v1345_v6 }
  0xc1   : > { %950 = vmatmul.bf16.gmra.mxu2 %v1349_v7 }
  0xc2   : > { %999 = vmatmul.bf16.gmra.mxu3 %v1353_v8 }
  0xcf   : > { %857 = vmatmul.bf16.gmra.mxu0 %v1357_v17 }
  0xd0   : > { %906 = vmatmul.bf16.gmra.mxu1 %v1361_v18 }
  0xd1   : > { %955 = vmatmul.bf16.gmra.mxu2 %v1365_v19 }
  0xd2   : > { %1004 = vmatmul.bf16.gmra.mxu3 %v1369_v20 }
  0xdf   : > { %862 = vmatmul.bf16.gmra.mxu0 %v1373_v29 }
  0xe0   : > { %911 = vmatmul.bf16.gmra.mxu1 %v1377_v30 }
  0xe1   : > { %960 = vmatmul.bf16.gmra.mxu2 %v1381_v31  ;;  %v361_v31 = vld [vmem:[#allocation2 + $0x8] sm:$0xff] }
  0xe2   : > { %1009 = vmatmul.bf16.gmra.mxu3 %v1385_v32 }
  0xec   : > { %v828_v33 = vpop.f32.mrf.mxu0 }
  0xed   : > { %v877_v34 = vpop.f32.mrf.mxu1 }
  0xee   : > { %v878_v35 = vadd.f32 %v877_v34, %v828_v33 }
  0xf4   : > { %v926_v36 = vpop.f32.mrf.mxu2  ;;  %v830_v39 = vpop.f32.mrf.mxu0 }
  0xf5   : > { %v975_v37 = vpop.f32.mrf.mxu3  ;;  %v927_v38 = vadd.f32 %v926_v36, %v878_v35  ;;  %v879_v40 = vpop.f32.mrf.mxu1 }
  0xf6   : > { %v880_v44 = vadd.f32 %v879_v40, %v830_v39  ;;  %v362_v40 = vld [vmem:[#allocation2 + $0x48] sm:$0xff] }
  0xf7   : > { %v976_v42 = vadd.f32 %v975_v37, %v927_v38 }
  0xf9   : > { %v1015_v43 = vadd.f32 %v976_v42, %v355_v41 }
  0xfb   : > { %1031 = vst [vmem:[#allocation2 + $0x30] sm:$0xff] %v1015_v43 }
  0xfc   : > { %v928_v45 = vpop.f32.mrf.mxu2  ;;  %v833_v48 = vpop.f32.mrf.mxu0 }
  0xfd   : > { %v977_v46 = vpop.f32.mrf.mxu3  ;;  %v929_v47 = vadd.f32 %v928_v45, %v880_v44  ;;  %v882_v49 = vpop.f32.mrf.mxu1 }
  0xfe   : > { %v883_v53 = vadd.f32 %v882_v49, %v833_v48  ;;  %v363_v49 = vld [vmem:[#allocation2 + $0x40] sm:$0xff] }
  0xff   : > { %v978_v51 = vadd.f32 %v977_v46, %v929_v47 }
 0x101   : > { %v1016_v52 = vadd.f32 %v978_v51, %v356_v50 }
 0x103   : > { %1032 = vst [vmem:[#allocation2] sm:$0xff] %v1016_v52 }
 0x104   : > { %v931_v54 = vpop.f32.mrf.mxu2  ;;  %v835_v57 = vpop.f32.mrf.mxu0 }
 0x105   : > { %v980_v55 = vpop.f32.mrf.mxu3  ;;  %v932_v56 = vadd.f32 %v931_v54, %v883_v53  ;;  %v884_v58 = vpop.f32.mrf.mxu1 }
 0x106   : > { %v885_v62 = vadd.f32 %v884_v58, %v835_v57  ;;  %v364_v58 = vld [vmem:[#allocation2 + $0x20] sm:$0xff] }
 0x107   : > { %v981_v60 = vadd.f32 %v980_v55, %v932_v56 }
 0x109   : > { %v1017_v61 = vadd.f32 %v981_v60, %v357_v59 }
 0x10b   : > { %1033 = vst [vmem:[#allocation2 + $0x58] sm:$0xff] %v1017_v61 }
 0x10c   : > { %v933_v63 = vpop.f32.mrf.mxu2  ;;  %v838_v2 = vpop.f32.mrf.mxu0 }
 0x10d   : > { %v982_v0 = vpop.f32.mrf.mxu3  ;;  %v934_v1 = vadd.f32 %v933_v63, %v885_v62  ;;  %v887_v3 = vpop.f32.mrf.mxu1 }
 0x10e   : > { %v888_v7 = vadd.f32 %v887_v3, %v838_v2  ;;  %v365_v3 = vld [vmem:[#allocation2 + $0x10] sm:$0xff] }
 0x10f   : > { %v983_v5 = vadd.f32 %v982_v0, %v934_v1 }
 0x111   : > { %v1018_v6 = vadd.f32 %v983_v5, %v358_v4 }
 0x113   : > { %1034 = vst [vmem:[#allocation2 + $0x18] sm:$0xff] %v1018_v6 }
 0x114   : > { %v936_v8 = vpop.f32.mrf.mxu2  ;;  %v840_v11 = vpop.f32.mrf.mxu0 }
 0x115   : > { %v985_v9 = vpop.f32.mrf.mxu3  ;;  %v937_v10 = vadd.f32 %v936_v8, %v888_v7  ;;  %v889_v12 = vpop.f32.mrf.mxu1 }
 0x116   : > { %v890_v16 = vadd.f32 %v889_v12, %v840_v11  ;;  %v366_v12 = vld [vmem:[#allocation2 + $0x38] sm:$0xff] }
 0x117   : > { %v986_v14 = vadd.f32 %v985_v9, %v937_v10 }
 0x119   : > { %v1019_v15 = vadd.f32 %v986_v14, %v359_v13 }
 0x11b   : > { %1035 = vst [vmem:[#allocation2 + $0x50] sm:$0xff] %v1019_v15 }
 0x11c   : > { %v938_v17 = vpop.f32.mrf.mxu2  ;;  %v843_v20 = vpop.f32.mrf.mxu0 }
 0x11d   : > { %v987_v18 = vpop.f32.mrf.mxu3  ;;  %v939_v19 = vadd.f32 %v938_v17, %v890_v16  ;;  %v892_v21 = vpop.f32.mrf.mxu1 }
 0x11e   : > { %v893_v25 = vadd.f32 %v892_v21, %v843_v20  ;;  %v367_v21 = vld [vmem:[#allocation2 + $0x60] sm:$0xff] }
 0x11f   : > { %v988_v23 = vadd.f32 %v987_v18, %v939_v19 }
 0x121   : > { %v1020_v24 = vadd.f32 %v988_v23, %v360_v22 }
 0x123   : > { %1036 = vst [vmem:[#allocation2 + $0x68] sm:$0xff] %v1020_v24 }
 0x124   : > { %v941_v26 = vpop.f32.mrf.mxu2  ;;  %v845_v29 = vpop.f32.mrf.mxu0 }
 0x125   : > { %v990_v27 = vpop.f32.mrf.mxu3  ;;  %v942_v28 = vadd.f32 %v941_v26, %v893_v25  ;;  %v894_v30 = vpop.f32.mrf.mxu1 }
 0x126   : > { %v895_v34 = vadd.f32 %v894_v30, %v845_v29 }
 0x127   : > { %v991_v32 = vadd.f32 %v990_v27, %v942_v28  ;;  %v368_v28 = vld [vmem:[#allocation2 + $0x70] sm:$0xff] }
 0x129   : > { %v1021_v33 = vadd.f32 %v991_v32, %v361_v31 }
 0x12b   : > { %1037 = vst [vmem:[#allocation2 + $0x8] sm:$0xff] %v1021_v33 }
 0x12c   : > { %v943_v35 = vpop.f32.mrf.mxu2  ;;  %v848_v38 = vpop.f32.mrf.mxu0 }
 0x12d   : > { %v992_v36 = vpop.f32.mrf.mxu3  ;;  %v944_v37 = vadd.f32 %v943_v35, %v895_v34  ;;  %v897_v39 = vpop.f32.mrf.mxu1 }
 0x12e   : > { %v898_v43 = vadd.f32 %v897_v39, %v848_v38 }
 0x12f   : > { %v993_v41 = vadd.f32 %v992_v36, %v944_v37  ;;  %v369_v37 = vld [vmem:[#allocation2 + $0x78] sm:$0xff] }
 0x131   : > { %v1022_v42 = vadd.f32 %v993_v41, %v362_v40 }
 0x133   : > { %1038 = vst [vmem:[#allocation2 + $0x48] sm:$0xff] %v1022_v42 }
 0x134   : > { %v946_v44 = vpop.f32.mrf.mxu2  ;;  %v850_v47 = vpop.f32.mrf.mxu0 }
 0x135   : > { %v995_v45 = vpop.f32.mrf.mxu3  ;;  %v947_v46 = vadd.f32 %v946_v44, %v898_v43  ;;  %v899_v48 = vpop.f32.mrf.mxu1 }
 0x136   : > { %v900_v52 = vadd.f32 %v899_v48, %v850_v47 }
 0x137   : > { %v996_v50 = vadd.f32 %v995_v45, %v947_v46  ;;  %v370_v45 = vld [vmem:[#allocation2 + $0x28] sm:$0xff] }
 0x139   : > { %v1023_v51 = vadd.f32 %v996_v50, %v363_v49 }
 0x13b   : > { %1039 = vst [vmem:[#allocation2 + $0x40] sm:$0xff] %v1023_v51 }
 0x13c   : > { %v948_v53 = vpop.f32.mrf.mxu2  ;;  %v853_v56 = vpop.f32.mrf.mxu0 }
 0x13d   : > { %v997_v54 = vpop.f32.mrf.mxu3  ;;  %v949_v55 = vadd.f32 %v948_v53, %v900_v52  ;;  %v902_v57 = vpop.f32.mrf.mxu1 }
 0x13e   : > { %v903_v61 = vadd.f32 %v902_v57, %v853_v56 }
 0x13f   : > { %v998_v59 = vadd.f32 %v997_v54, %v949_v55 }
 0x141   : > { %v1024_v60 = vadd.f32 %v998_v59, %v364_v58 }
 0x143   : > { %1040 = vst [vmem:[#allocation2 + $0x20] sm:$0xff] %v1024_v60 }
 0x144   : > { %v951_v62 = vpop.f32.mrf.mxu2  ;;  %v855_v1 = vpop.f32.mrf.mxu0 }
 0x145   : > { %v1000_v63 = vpop.f32.mrf.mxu3  ;;  %v952_v0 = vadd.f32 %v951_v62, %v903_v61  ;;  %v904_v2 = vpop.f32.mrf.mxu1 }
 0x146   : > { %v905_v6 = vadd.f32 %v904_v2, %v855_v1 }
 0x147   : > { %v1001_v4 = vadd.f32 %v1000_v63, %v952_v0 }
 0x149   : > { %v1025_v5 = vadd.f32 %v1001_v4, %v365_v3 }
 0x14b   : > { %1041 = vst [vmem:[#allocation2 + $0x10] sm:$0xff] %v1025_v5 }
 0x14c   : > { %v953_v7 = vpop.f32.mrf.mxu2  ;;  %v858_v10 = vpop.f32.mrf.mxu0 }
 0x14d   : > { %v1002_v8 = vpop.f32.mrf.mxu3  ;;  %v954_v9 = vadd.f32 %v953_v7, %v905_v6  ;;  %v907_v11 = vpop.f32.mrf.mxu1 }
 0x14e   : > { %v908_v15 = vadd.f32 %v907_v11, %v858_v10 }
 0x14f   : > { %v1003_v13 = vadd.f32 %v1002_v8, %v954_v9 }
 0x151   : > { %v1026_v14 = vadd.f32 %v1003_v13, %v366_v12 }
 0x153   : > { %1042 = vst [vmem:[#allocation2 + $0x38] sm:$0xff] %v1026_v14 }
 0x154   : > { %v956_v16 = vpop.f32.mrf.mxu2  ;;  %v860_v19 = vpop.f32.mrf.mxu0 }
 0x155   : > { %v1005_v17 = vpop.f32.mrf.mxu3  ;;  %v957_v18 = vadd.f32 %v956_v16, %v908_v15  ;;  %v909_v20 = vpop.f32.mrf.mxu1 }
 0x156   : > { %v910_v24 = vadd.f32 %v909_v20, %v860_v19 }
 0x157   : > { %v1006_v22 = vadd.f32 %v1005_v17, %v957_v18 }
 0x159   : > { %v1027_v23 = vadd.f32 %v1006_v22, %v367_v21 }
 0x15b   : > { %1043 = vst [vmem:[#allocation2 + $0x60] sm:$0xff] %v1027_v23 }
 0x15c   : > { %v958_v25 = vpop.f32.mrf.mxu2  ;;  %v863_v29 = vpop.f32.mrf.mxu0 }
 0x15d   : > { %v1007_v26 = vpop.f32.mrf.mxu3  ;;  %v959_v27 = vadd.f32 %v958_v25, %v910_v24  ;;  %v912_v30 = vpop.f32.mrf.mxu1 }
 0x15e   : > { %v913_v33 = vadd.f32 %v912_v30, %v863_v29 }
 0x15f   : > { %v1008_v31 = vadd.f32 %v1007_v26, %v959_v27 }
 0x161   : > { %v1028_v32 = vadd.f32 %v1008_v31, %v368_v28 }
 0x163   : > { %1044 = vst [vmem:[#allocation2 + $0x70] sm:$0xff] %v1028_v32 }
 0x164   : > { %v961_v34 = vpop.f32.mrf.mxu2  ;;  %v865_v39 = vpop.f32.mrf.mxu0 }
 0x165   : > { %v1010_v35 = vpop.f32.mrf.mxu3  ;;  %v962_v36 = vadd.f32 %v961_v34, %v913_v33  ;;  %v914_v40 = vpop.f32.mrf.mxu1 }
 0x166   : > { %v915_v42 = vadd.f32 %v914_v40, %v865_v39 }
 0x167   : > { %v1011_v38 = vadd.f32 %v1010_v35, %v962_v36 }
 0x169   : > { %v1029_v41 = vadd.f32 %v1011_v38, %v369_v37 }
 0x16b   : > { %1045 = vst [vmem:[#allocation2 + $0x78] sm:$0xff] %v1029_v41 }
 0x16c   : > { %v963_v43 = vpop.f32.mrf.mxu2 }
 0x16d   : > { %v964_v44 = vadd.f32 %v963_v43, %v915_v42  ;;  %v1012_v46 = vpop.f32.mrf.mxu3 }
 0x16f   : > { %v1013_v47 = vadd.f32 %v1012_v46, %v964_v44  ;;  %1050 = sbr.rel (%p1514_p11) target bundleno = 388 (0x184), region = 63 }
 0x171   : > { %v1030_v48 = vadd.f32 %v1013_v47, %v370_v45 }
 0x173   : > { %1046 = vst [vmem:[#allocation2 + $0x28] sm:$0xff] %v1030_v48 }
 0x174   : > { %v1051_v49 = vld [vmem:[#allocation2 + $0x30] sm:$0xff]  ;;  %v1052_v50 = vld [vmem:[#allocation2] sm:$0xff]  ;;  %v1053_v52 = vld [vmem:[#allocation2 + $0x58] sm:$0xff] }
 0x175   : > { %v1672_v51 = vld [vmem:[%s1998_s2] ss:$0 sm:$0xff]  ;;  %v1054_v53 = vld [vmem:[#allocation2 + $0x18] sm:$0xff]  ;;  %v1055_v54 = vld [vmem:[#allocation2 + $0x50] sm:$0xff] }
 0x176   : > { %v1056_v55 = vld [vmem:[#allocation2 + $0x68] sm:$0xff]  ;;  %v1071_v57 = vadd.f32 %v1672_v51, %v1051_v49  ;;  %v1072_v58 = vadd.f32 %v1672_v51, %v1052_v50  ;;  %v1073_v59 = vadd.f32 %v1672_v51, %v1053_v52  ;;  %v1074_v60 = vadd.f32 %v1672_v51, %v1054_v53  ;;  %v1059_v2 = vld [vmem:[#allocation2 + $0x40] sm:$0xff]  ;;  %v1061_v8 = vld [vmem:[#allocation2 + $0x10] sm:$0xff] }
 0x177   : > { %v1057_v56 = vld [vmem:[#allocation2 + $0x8] sm:$0xff]  ;;  %v1075_v62 = vadd.f32 %v1672_v51, %v1055_v54  ;;  %v1076_v63 = vadd.f32 %v1672_v51, %v1056_v55  ;;  %v1060_v3 = vld [vmem:[#allocation2 + $0x20] sm:$0xff]  ;;  %v1062_v9 = vld [vmem:[#allocation2 + $0x38] sm:$0xff]  ;;  %v1079_v18 = vadd.f32 %v1672_v51, %v1059_v2  ;;  %v1081_v24 = vadd.f32 %v1672_v51, %v1061_v8 }
 0x178   : > { %v1058_v61 = vld [vmem:[#allocation2 + $0x48] sm:$0xff]  ;;  %v1077_v0 = vadd.f32 %v1672_v51, %v1057_v56  ;;  %v1087_v4 = vmax.f32 %v1071_v57, 0.0  ;;  %v1088_v5 = vmax.f32 %v1072_v58, 0.0  ;;  %v1089_v6 = vmax.f32 %v1073_v59, 0.0  ;;  %v1063_v14 = vld [vmem:[#allocation2 + $0x60] sm:$0xff]  ;;  %v1064_v15 = vld [vmem:[#allocation2 + $0x70] sm:$0xff] }
 0x179   : > { %v1078_v1 = vadd.f32 %v1672_v51, %v1058_v61  ;;  %v1090_v7 = vmax.f32 %v1074_v60, 0.0  ;;  %v1091_v10 = vmax.f32 %v1075_v62, 0.0  ;;  %v1092_v11 = vmax.f32 %v1076_v63, 0.0  ;;  %v1065_v20 = vld [vmem:[#allocation2 + $0x78] sm:$0xff] }
 0x17a   : > { %v1093_v12 = vmax.f32 %v1077_v0, 0.0  ;;  %v1587_v16 = vpack.c.bf16 %v1088_v5, %v1087_v4  ;;  %v1080_v19 = vadd.f32 %v1672_v51, %v1060_v3  ;;  %v1066_v21 = vld [vmem:[#allocation2 + $0x28] sm:$0xff]  ;;  %v1082_v25 = vadd.f32 %v1672_v51, %v1062_v9 }
 0x17b   : > { %v1094_v13 = vmax.f32 %v1078_v1, 0.0  ;;  %v1592_v17 = vpack.c.bf16 %v1090_v7, %v1089_v6  ;;  %v1597_v22 = vpack.c.bf16 %v1092_v11, %v1091_v10  ;;  %v1095_v26 = vmax.f32 %v1079_v18, 0.0 }
 0x17c   : > { %1588 = vst [vmem:[%s1999_s3] sm:$0xff] %v1587_v16   ;;  %v1096_v27 = vmax.f32 %v1080_v19, 0.0  ;;  %v1083_v28 = vadd.f32 %v1672_v51, %v1063_v14  ;;  %v1084_v29 = vadd.f32 %v1672_v51, %v1064_v15  ;;  %v1097_v30 = vmax.f32 %v1081_v24, 0.0 }
 0x17d   : > { %v1602_v23 = vpack.c.bf16 %v1094_v13, %v1093_v12  ;;  %1624 = vst [vmem:[%s1999_s3 + $0x8] sm:$0xff] %v1592_v17   ;;  %v1098_v31 = vmax.f32 %v1082_v25, 0.0  ;;  %v1085_v32 = vadd.f32 %v1672_v51, %v1065_v20  ;;  %v1086_v33 = vadd.f32 %v1672_v51, %v1066_v21 }
 0x17e   : > { %1625 = vst [vmem:[%s1999_s3 + $0x10] sm:$0xff] %v1597_v22   ;;  %v1607_v34 = vpack.c.bf16 %v1096_v27, %v1095_v26  ;;  %v1099_v35 = vmax.f32 %v1083_v28, 0.0  ;;  %v1100_v36 = vmax.f32 %v1084_v29, 0.0 }
 0x17f   : > { %1626 = vst [vmem:[%s1999_s3 + $0x18] sm:$0xff] %v1602_v23   ;;  %v1612_v37 = vpack.c.bf16 %v1098_v31, %v1097_v30  ;;  %v1101_v38 = vmax.f32 %v1085_v32, 0.0  ;;  %v1102_v39 = vmax.f32 %v1086_v33, 0.0 }
 0x180   : > { %1627 = vst [vmem:[%s1999_s3 + $0x20] sm:$0xff] %v1607_v34   ;;  %v1617_v40 = vpack.c.bf16 %v1100_v36, %v1099_v35 }
 0x181   : > { %1628 = vst [vmem:[%s1999_s3 + $0x28] sm:$0xff] %v1612_v37   ;;  %v1622_v41 = vpack.c.bf16 %v1102_v39, %v1101_v38 }
 0x182   : > { %1629 = vst [vmem:[%s1999_s3 + $0x30] sm:$0xff] %v1617_v40  }
 0x183   : > { %1630 = vst [vmem:[%s1999_s3 + $0x38] sm:$0xff] %v1622_v41  }
 0x184 PF: > { %s13_s16 = sadd.s32 1, %s1711_s16   ;;  %s2000_s12 = smov %s1699_s13 }
 0x185   : > { %p10_p12 = scmp.ge.s32.totalorder %s13_s16, 7   ;;  %s2001_s13 = smov %s1769_s20 }
 0x186   : > { %s2002_s14 = smov %s1707_s15  ;;  %s2003_s15 = smov %s2005_s17 }
 0x187   :  { %12 = sbr.rel (!%p10_p12) target bundleno = 3 (0x3), region = 104 }

// kernel: snnl_forward.6
= control target key start
LH: loop header
LB: loop body
LE: loop exit
PB: predicated region body
PF: predicated region fallthrough
CT: control target
= control target key end

     0   :  { %s1158_s12 = smov 0   ;;  %s1160_s13 = smov 0   ;;  %s1286_s0 = inlined_call_operand.vmem [shape: bf16[32,3584], index: 0, kind: input, shape index: {}]   ;;  %s1287_s1 = inlined_call_operand.vmem [shape: bf16[3584,128], index: 1, kind: input, shape index: {}]   ;;  %s1288_s2 = inlined_call_operand.vmem [shape: f32[1,128], index: 2, kind: input, shape index: {}]   ;;  %s1289_s3 = inlined_call_operand.vmem [shape: bf16[32,128], index: 3, kind: output, shape index: {}]  }
   0x1   :  { %s1162_s14 = smov 0   ;;  %s1164_s15 = smov 0  }
   0x2   :  { %s1166_s16 = smov 0  }
   0x3 LB: > { %s25_s17 = sadd.s32 1, %s1131_s15  ;;  %p48_p1 = scmp.ne.s32.totalorder %s1123_s13, %s1119_s12  ;;  %s1135_s16 = sphi %s1166_s16, %s13_s16   ;;  %s1131_s15 = sphi %s1164_s15, %s1293_s15   ;;  %s1127_s14 = sphi %s1162_s14, %s1292_s14   ;;  %s1123_s13 = sphi %s1160_s13, %s1291_s13   ;;  %s1119_s12 = sphi %s1158_s12, %s1290_s12  }
   0x4   : > { %p26_p0 = scmp.ge.s32.totalorder %s25_s17, 7  ;;  %p49_p2 = scmp.eq.s32.totalorder %s1135_s16, 0 }
   0x5   : > { %s41_s19 = sadd.s32 1, %s1123_s13  ;;  %p829_p5 = scmp.ge.s32.totalorder %s1135_s16, 7 }
   0x6   : > { %s1295_s17 = smov (%p26_p0, %s25_s17), 0  ;;  %p50_p3 = por %p49_p2, %p48_p1 }
   0x7   : > { %s37_s18 = ssub.s32 %s1131_s15, %s1295_s17  ;;  %162 = sbr.rel (%p829_p5) target bundleno = 24 (0x18), region = 20 }
   0x8   : > { %p39_p4 = scmp.eq.s32.totalorder %s37_s18, 0 }
   0xa   : > { %s1193_s20 = scalar_select %p39_p4, %s1123_s13, %s41_s19  }
   0xc   : > { %165 = sbr.rel (!%p50_p3) target bundleno = 24 (0x18), region = 24  ;;  %s167_s21 = sand.u32 (%p50_p3), 1, %s1123_s13  }
   0xd   : > { %s1003_s22 = sshll.u32 (%p50_p3), %s1131_s15, 4  ;;  %s830_s23 = sshll.u32 (%p50_p3), %s167_s21, 6 }
   0xe   : > { %s175_s26 = scalar_lea.vmem (%p50_p3), %s1286_s0, %s1003_s22  ;;  %s169_s27 = scalar_lea.vmem (%p50_p3), [#allocation3], %s830_s23 }
   0xf   : > { %v188_v0 = vld [vmem:[%s175_s26] sm:$0xff] (%p50_p3)  ;;  %v190_v1 = vld [vmem:[%s175_s26 + $0x8] sm:$0xff] (%p50_p3)  ;;  %v192_v2 = vld [vmem:[%s175_s26 + $0x70] sm:$0xff] (%p50_p3) }
  0x10   : > { %189 = vst [vmem:[%s169_s27] sm:$0xff] (%p50_p3), %v188_v0  ;;  %v194_v3 = vld [vmem:[%s175_s26 + $0x78] sm:$0xff] (%p50_p3)  ;;  %v196_v4 = vld [vmem:[%s175_s26 + $0xe0] sm:$0xff] (%p50_p3)  ;;  %v198_v5 = vld [vmem:[%s175_s26 + $0xe8] sm:$0xff] (%p50_p3) }
  0x11   : > { %191 = vst [vmem:[%s169_s27 + $0x8] sm:$0xff] %v190_v1  ;;  %v200_v6 = vld [vmem:[%s175_s26 + $0x150] sm:$0xff]  ;;  %v202_v7 = vld [vmem:[%s175_s26 + $0x158] sm:$0xff] }
  0x12   : > { %193 = vst [vmem:[%s169_s27 + $0x10] sm:$0xff] %v192_v2 }
  0x13   : > { %195 = vst [vmem:[%s169_s27 + $0x18] sm:$0xff] %v194_v3 }
  0x14   : > { %197 = vst [vmem:[%s169_s27 + $0x20] sm:$0xff] %v196_v4 }
  0x15   : > { %199 = vst [vmem:[%s169_s27 + $0x28] sm:$0xff] %v198_v5 }
  0x16   : > { %201 = vst [vmem:[%s169_s27 + $0x30] sm:$0xff] %v200_v6 }
  0x17   : > { %203 = vst [vmem:[%s169_s27 + $0x38] sm:$0xff] %v202_v7 }
  0x18 PF: > { %p833_p6 = scmp.ge.s32.totalorder %s1135_s16, 1  ;;  %p220_p7 = scmp.lt.s32.totalorder %s1135_s16, 8 }
  0x1a   : > { %p221_p8 = pnand %p833_p6, %p220_p7 }
  0x1b   : > { %s227_s28 = sand.u32 (!%p221_p8), 1, %s1119_s12   ;;  %s835_s29 = sshll.u32 (!%p221_p8), %s1127_s14, 6 }
  0x1c   : > { %224 = sbr.rel (%p221_p8) target bundleno = 254 (0xfe), region = 51  ;;  %s834_s30 = sshll.u32 (!%p221_p8), %s227_s28, 6 }
  0x1d   : > { %p267_p9 = scmp.lt.s32.totalorder (!%p221_p8), %s835_s29, 447  ;;  %s1210_s8 = scalar_lea.vmem (!%p221_p8), [#allocation3], %s834_s30 }
  0x1e   : > { %p837_p10 = scmp.ne.s32.totalorder (!%p221_p8), %s1127_s14, 0 }
  0x21   : > { %s1297_s29 = smov (!%p267_p9, %s835_s29), 447  ;;  %290 = sbr.rel (%p837_p10) target bundleno = 43 (0x2b), region = 59 }
  0x22   : > { %s836_s4 = sshll.u32 %s1297_s29, 2 }
  0x23   : > { %s1208_s7 = scalar_lea.vmem %s1287_s1, %s836_s4 }
  0x26   : > { %v1137_v8 = vmov 0.0  }
  0x27   : > { %291 = vst [vmem:[#allocation2 + $0x10] sm:$0xff] %v1137_v8 }
  0x28   : > { %292 = vst [vmem:[#allocation2] sm:$0xff] %v1137_v8 }
  0x29   : > { %293 = vst [vmem:[#allocation2 + $0x18] sm:$0xff] %v1137_v8 }
  0x2a   : > { %294 = vst [vmem:[#allocation2 + $0x8] sm:$0xff] %v1137_v8 }
  0x2b PF: > { %v1019_v9 = vld [vmem:[%s1208_s7 + $0x38] sm:$0xff]  ;;  %v1018_v13 = vld [vmem:[%s1208_s7 + $0x30] sm:$0xff]  ;;  %v1017_v17 = vld [vmem:[%s1208_s7 + $0x28] sm:$0xff]  ;;  %p998_p11 = scmp.ne.s32.totalorder %s1127_s14, 6 }
  0x2c   : > { %v1027_v10 = vld [vmem:[%s1208_s7 + $0x78] sm:$0xff]  ;;  %603 = vmatpush.bf16.msra.mxu0 %v1019_v9  ;;  %v1026_v14 = vld [vmem:[%s1208_s7 + $0x70] sm:$0xff]  ;;  %v1025_v18 = vld [vmem:[%s1208_s7 + $0x68] sm:$0xff] }
  0x2d   : > { %v1035_v11 = vld [vmem:[%s1208_s7 + $0xb8] sm:$0xff]  ;;  %622 = vmatpush.bf16.msra.mxu1 %v1027_v10  ;;  %v1034_v15 = vld [vmem:[%s1208_s7 + $0xb0] sm:$0xff]  ;;  %v1033_v19 = vld [vmem:[%s1208_s7 + $0xa8] sm:$0xff] }
  0x2e   : > { %v1043_v12 = vld [vmem:[%s1208_s7 + $0xf8] sm:$0xff]  ;;  %641 = vmatpush.bf16.msra.mxu2 %v1035_v11  ;;  %v1042_v16 = vld [vmem:[%s1208_s7 + $0xf0] sm:$0xff]  ;;  %v1041_v20 = vld [vmem:[%s1208_s7 + $0xe8] sm:$0xff] }
  0x2f   : > { %660 = vmatpush.bf16.msra.mxu3 %v1043_v12  ;;  %v1016_v21 = vld [vmem:[%s1208_s7 + $0x20] sm:$0xff]  ;;  %v1015_v25 = vld [vmem:[%s1208_s7 + $0x18] sm:$0xff]  ;;  %v1014_v29 = vld [vmem:[%s1208_s7 + $0x10] sm:$0xff] }
  0x30   : > { %604 = vmatpush.bf16.msra.mxu0 %v1018_v13  ;;  %v1024_v22 = vld [vmem:[%s1208_s7 + $0x60] sm:$0xff]  ;;  %v1023_v26 = vld [vmem:[%s1208_s7 + $0x58] sm:$0xff]  ;;  %v1022_v30 = vld [vmem:[%s1208_s7 + $0x50] sm:$0xff] }
  0x31   : > { %623 = vmatpush.bf16.msra.mxu1 %v1026_v14  ;;  %v1032_v23 = vld [vmem:[%s1208_s7 + $0xa0] sm:$0xff]  ;;  %v1031_v27 = vld [vmem:[%s1208_s7 + $0x98] sm:$0xff]  ;;  %v1030_v31 = vld [vmem:[%s1208_s7 + $0x90] sm:$0xff] }
  0x32   : > { %642 = vmatpush.bf16.msra.mxu2 %v1034_v15  ;;  %v1040_v24 = vld [vmem:[%s1208_s7 + $0xe0] sm:$0xff]  ;;  %v1039_v28 = vld [vmem:[%s1208_s7 + $0xd8] sm:$0xff]  ;;  %v1038_v32 = vld [vmem:[%s1208_s7 + $0xd0] sm:$0xff] }
  0x33   : > { %661 = vmatpush.bf16.msra.mxu3 %v1042_v16  ;;  %v1013_v33 = vld [vmem:[%s1208_s7 + $0x8] sm:$0xff]  ;;  %v1012_v37 = vld [vmem:[%s1208_s7] sm:$0xff]  ;;  %v1006_v42 = vld [vmem:[%s1210_s8 + $0xc] sm:$0xf0] }
  0x34   : > { %605 = vmatpush.bf16.msra.mxu0 %v1017_v17  ;;  %v1021_v34 = vld [vmem:[%s1208_s7 + $0x48] sm:$0xff]  ;;  %v1020_v38 = vld [vmem:[%s1208_s7 + $0x40] sm:$0xff]  ;;  %v842_v44 = vld [vmem:[%s1210_s8 + $0x10] sm:$0xf0] }
  0x35   : > { %624 = vmatpush.bf16.msra.mxu1 %v1025_v18  ;;  %v1029_v35 = vld [vmem:[%s1208_s7 + $0x88] sm:$0xff]  ;;  %v1028_v39 = vld [vmem:[%s1208_s7 + $0x80] sm:$0xff]  ;;  %v1007_v46 = vld [vmem:[%s1210_s8 + $0x14] sm:$0xf0] }
  0x36   : > { %643 = vmatpush.bf16.msra.mxu2 %v1033_v19  ;;  %v1037_v36 = vld [vmem:[%s1208_s7 + $0xc8] sm:$0xff]  ;;  %v1036_v40 = vld [vmem:[%s1208_s7 + $0xc0] sm:$0xff]  ;;  %v850_v48 = vld [vmem:[%s1210_s8 + $0x18] sm:$0xf0] }
  0x37   : > { %662 = vmatpush.bf16.msra.mxu3 %v1041_v20  ;;  %v840_v41 = vld [vmem:[%s1210_s8] sm:$0xf]  ;;  %v1004_v43 = vld [vmem:[%s1210_s8 + $0x4] sm:$0xf]  ;;  %v848_v45 = vld [vmem:[%s1210_s8 + $0x8] sm:$0xf] }
  0x38   : > { %606 = vmatpush.bf16.msra.mxu0 %v1016_v21  ;;  %v1005_v47 = vld [vmem:[%s1210_s8 + $0xc] sm:$0xf]  ;;  %v841_v49 = vor.u32 %v1006_v42, %v840_v41  ;;  %v845_v50 = vor.u32 %v1004_v43, %v842_v44  ;;  %v849_v51 = vor.u32 %v1007_v46, %v848_v45  ;;  %v856_v53 = vld [vmem:[%s1210_s8 + $0x20] sm:$0xf]  ;;  %v1010_v54 = vld [vmem:[%s1210_s8 + $0x2c] sm:$0xf0] }
  0x39   : > { %625 = vmatpush.bf16.msra.mxu1 %v1024_v22  ;;  %v853_v52 = vor.u32 %v1005_v47, %v850_v48  ;;  %v1008_v55 = vld [vmem:[%s1210_s8 + $0x24] sm:$0xf]  ;;  %v858_v56 = vld [vmem:[%s1210_s8 + $0x30] sm:$0xf0]  ;;  %v864_v57 = vld [vmem:[%s1210_s8 + $0x28] sm:$0xf]  ;;  %v857_v61 = vor.u32 %v1010_v54, %v856_v53 }
  0x3a   : > { %644 = vmatpush.bf16.msra.mxu2 %v1032_v23  ;;  %v1011_v58 = vld [vmem:[%s1210_s8 + $0x34] sm:$0xf0]  ;;  %v1009_v59 = vld [vmem:[%s1210_s8 + $0x2c] sm:$0xf]  ;;  %v866_v60 = vld [vmem:[%s1210_s8 + $0x38] sm:$0xf0]  ;;  %v861_v62 = vor.u32 %v1008_v55, %v858_v56 }
  0x3b   : > { %663 = vmatpush.bf16.msra.mxu3 %v1040_v24  ;;  %v865_v63 = vor.u32 %v1011_v58, %v864_v57  ;;  %v869_v0 = vor.u32 %v1009_v59, %v866_v60  ;;  %v295_v9 = vld [vmem:[#allocation2 + $0x10] sm:$0xff]  ;;  %v296_v16 = vld [vmem:[#allocation2] sm:$0xff] }
  0x3c   : > { %607 = vmatpush.bf16.msra.mxu0 %v1015_v25  ;;  %v297_v25 = vld [vmem:[#allocation2 + $0x18] sm:$0xff] }
  0x3d   : > { %626 = vmatpush.bf16.msra.mxu1 %v1023_v26 }
  0x3e   : > { %645 = vmatpush.bf16.msra.mxu2 %v1031_v27 }
  0x3f   : > { %664 = vmatpush.bf16.msra.mxu3 %v1039_v28 }
  0x40   : > { %608 = vmatpush.bf16.msra.mxu0 %v1014_v29 }
  0x41   : > { %627 = vmatpush.bf16.msra.mxu1 %v1022_v30 }
  0x42   : > { %646 = vmatpush.bf16.msra.mxu2 %v1030_v31 }
  0x43   : > { %665 = vmatpush.bf16.msra.mxu3 %v1038_v32 }
  0x44   : > { %609 = vmatpush.bf16.msra.mxu0 %v1013_v33  ;;  %v298_v33 = vld [vmem:[#allocation2 + $0x8] sm:$0xff] }
  0x45   : > { %628 = vmatpush.bf16.msra.mxu1 %v1021_v34 }
  0x46   : > { %647 = vmatpush.bf16.msra.mxu2 %v1029_v35 }
  0x47   : > { %666 = vmatpush.bf16.msra.mxu3 %v1037_v36 }
  0x48   : > { %610 = vmatpush.bf16.msra.mxu0 %v1012_v37 }
  0x49   : > { %629 = vmatpush.bf16.msra.mxu1 %v1020_v38 }
  0x4a   : > { %648 = vmatpush.bf16.msra.mxu2 %v1028_v39 }
  0x4b   : > { %667 = vmatpush.bf16.msra.mxu3 %v1036_v40  ;;  %611 = vmatmul.bf16.vlgmr.msra.gmra.mxu0 %v841_v49 }
  0x4c   : > { %630 = vmatmul.bf16.vlgmr.msra.gmra.mxu1 %v845_v50 }
  0x4d   : > { %649 = vmatmul.bf16.vlgmr.msra.gmra.mxu2 %v849_v51 }
  0x4e   : > { %668 = vmatmul.bf16.vlgmr.msra.gmra.mxu3 %v853_v52 }
  0x5b   : > { %616 = vmatmul.bf16.gmra.mxu0 %v857_v61 }
  0x5c   : > { %635 = vmatmul.bf16.gmra.mxu1 %v861_v62 }
  0x5d   : > { %654 = vmatmul.bf16.gmra.mxu2 %v865_v63 }
  0x5e   : > { %673 = vmatmul.bf16.gmra.mxu3 %v869_v0 }
  0xc8   : > { %v612_v1 = vpop.f32.mrf.mxu0 }
  0xc9   : > { %v631_v2 = vpop.f32.mrf.mxu1 }
  0xca   : > { %v632_v3 = vadd.f32 %v631_v2, %v612_v1 }
  0xd0   : > { %v650_v4 = vpop.f32.mrf.mxu2  ;;  %v614_v7 = vpop.f32.mrf.mxu0 }
  0xd1   : > { %v669_v5 = vpop.f32.mrf.mxu3  ;;  %v651_v6 = vadd.f32 %v650_v4, %v632_v3  ;;  %v633_v8 = vpop.f32.mrf.mxu1 }
  0xd2   : > { %v634_v12 = vadd.f32 %v633_v8, %v614_v7 }
  0xd3   : > { %v670_v10 = vadd.f32 %v669_v5, %v651_v6 }
  0xd5   : > { %v679_v11 = vadd.f32 %v670_v10, %v295_v9 }
  0xd7   : > { %683 = vst [vmem:[#allocation2 + $0x10] sm:$0xff] %v679_v11 }
  0xd8   : > { %v652_v13 = vpop.f32.mrf.mxu2  ;;  %v617_v17 = vpop.f32.mrf.mxu0 }
  0xd9   : > { %v671_v14 = vpop.f32.mrf.mxu3  ;;  %v653_v15 = vadd.f32 %v652_v13, %v634_v12  ;;  %v636_v18 = vpop.f32.mrf.mxu1 }
  0xda   : > { %v637_v21 = vadd.f32 %v636_v18, %v617_v17 }
  0xdb   : > { %v672_v19 = vadd.f32 %v671_v14, %v653_v15 }
  0xdd   : > { %v680_v20 = vadd.f32 %v672_v19, %v296_v16 }
  0xdf   : > { %684 = vst [vmem:[#allocation2] sm:$0xff] %v680_v20 }
  0xe0   : > { %v655_v22 = vpop.f32.mrf.mxu2  ;;  %v619_v27 = vpop.f32.mrf.mxu0 }
  0xe1   : > { %v674_v23 = vpop.f32.mrf.mxu3  ;;  %v656_v24 = vadd.f32 %v655_v22, %v637_v21  ;;  %v638_v28 = vpop.f32.mrf.mxu1 }
  0xe2   : > { %v639_v30 = vadd.f32 %v638_v28, %v619_v27 }
  0xe3   : > { %v675_v26 = vadd.f32 %v674_v23, %v656_v24 }
  0xe5   : > { %v681_v29 = vadd.f32 %v675_v26, %v297_v25 }
  0xe7   : > { %685 = vst [vmem:[#allocation2 + $0x18] sm:$0xff] %v681_v29 }
  0xe8   : > { %v657_v31 = vpop.f32.mrf.mxu2 }
  0xe9   : > { %v658_v32 = vadd.f32 %v657_v31, %v639_v30  ;;  %v676_v34 = vpop.f32.mrf.mxu3 }
  0xeb   : > { %v677_v35 = vadd.f32 %v676_v34, %v658_v32  ;;  %690 = sbr.rel (%p998_p11) target bundleno = 254 (0xfe), region = 63 }
  0xed   : > { %v682_v36 = vadd.f32 %v677_v35, %v298_v33 }
  0xef   : > { %686 = vst [vmem:[#allocation2 + $0x8] sm:$0xff] %v682_v36 }
  0xf0   : > { %v691_v37 = vld [vmem:[#allocation2 + $0x10] sm:$0xff]  ;;  %v692_v38 = vld [vmem:[#allocation2] sm:$0xff]  ;;  %v693_v40 = vld [vmem:[#allocation2 + $0x18] sm:$0xff] }
  0xf1   : > { %v1096_v39 = vld [vmem:[%s1288_s2] ss:$0 sm:$0xff] }
  0xf2   : > { %v699_v42 = vadd.f32 %v1096_v39, %v691_v37  ;;  %v700_v43 = vadd.f32 %v1096_v39, %v692_v38  ;;  %v701_v44 = vadd.f32 %v1096_v39, %v693_v40 }
  0xf4   : > { %v703_v46 = vmax.f32 %v699_v42, 0.0  ;;  %v704_v47 = vmax.f32 %v700_v43, 0.0  ;;  %v705_v48 = vmax.f32 %v701_v44, 0.0 }
  0xf6   : > { %v694_v41 = vld [vmem:[#allocation2 + $0x8] sm:$0xff]  ;;  %v1047_v50 = vpack.c.bf16 %v704_v47, %v703_v46 }
  0xf7   : > { %v702_v45 = vadd.f32 %v1096_v39, %v694_v41 }
  0xf8   : > { %1048 = vst [vmem:[%s1289_s3] sm:$0xff] %v1047_v50  }
  0xf9   : > { %v706_v49 = vmax.f32 %v702_v45, 0.0 }
  0xfb   : > { %v1052_v51 = vpack.c.bf16 %v706_v49, %v705_v48 }
  0xfd   : > { %1054 = vst [vmem:[%s1289_s3 + $0x8] sm:$0xff] %v1052_v51  }
  0xfe PF: > { %s13_s16 = sadd.s32 1, %s1135_s16   ;;  %s1290_s12 = smov %s1123_s13 }
  0xff   : > { %p10_p12 = scmp.ge.s32.totalorder %s13_s16, 9   ;;  %s1291_s13 = smov %s1193_s20 }
 0x100   : > { %s1292_s14 = smov %s1131_s15  ;;  %s1293_s15 = smov %s1295_s17 }
 0x101   :  { %12 = sbr.rel (!%p10_p12) target bundleno = 3 (0x3), region = 104 }

// kernel: snnl_forward.7
= control target key start
LH: loop header
LB: loop body
LE: loop exit
PB: predicated region body
PF: predicated region fallthrough
CT: control target
= control target key end

     0   :  { %s952_s12 = smov 0   ;;  %s954_s13 = smov 0   ;;  %s1035_s0 = inlined_call_operand.vmem [shape: bf16[8,2048], index: 0, kind: input, shape index: {}]   ;;  %s1036_s1 = inlined_call_operand.vmem [shape: bf16[2048,128], index: 1, kind: input, shape index: {}]   ;;  %s1037_s2 = inlined_call_operand.vmem [shape: f32[1,128], index: 2, kind: input, shape index: {}]   ;;  %s1038_s3 = inlined_call_operand.vmem [shape: f32[8,128], index: 3, kind: output, shape index: {}]  }
   0x1   :  { %s956_s14 = smov 0  }
   0x2 LB: > { %s25_s15 = sadd.s32 1, %s925_s13  ;;  %p711_p0 = scmp.ge.s32.totalorder %s929_s14, 1  ;;  %s929_s14 = sphi %s956_s14, %s13_s14   ;;  %s925_s13 = sphi %s954_s13, %s1040_s13   ;;  %s921_s12 = sphi %s952_s12, %s1039_s12  }
   0x3   : > { %p26_p1 = scmp.ge.s32.totalorder %s25_s15, 4  ;;  %p189_p2 = scmp.lt.s32.totalorder %s929_s14, 5 }
   0x5   : > { %s1042_s15 = smov (%p26_p1, %s25_s15), 0  ;;  %p190_p3 = pnand %p711_p0, %p189_p2 }
   0x6   : > { %s712_s16 = sshll.u32 (!%p190_p3), %s921_s12, 2  ;;  %s714_s17 = sshll.u32 (!%p190_p3), %s921_s12, 6 }
   0x7   : > { %193 = sbr.rel (%p190_p3) target bundleno = 205 (0xcd), region = 32  ;;  %p233_p4 = scmp.lt.s32.totalorder (!%p190_p3), %s712_s16, 15 }
   0x8   : > { %p241_p5 = scmp.lt.s32.totalorder (!%p190_p3), %s714_s17, 255  ;;  %p716_p6 = scmp.ne.s32.totalorder (!%p190_p3), %s921_s12, 0 }
   0xc   : > { %s1044_s16 = smov (!%p233_p4, %s712_s16), 15  ;;  %s1046_s17 = smov (!%p241_p5, %s714_s17), 255 }
   0xd   : > { %s713_s18 = sshll.u32 %s1044_s16, 2  ;;  %s715_s22 = sshll.u32 %s1046_s17, 2 }
   0xe   : > { %s977_s21 = scalar_lea.vmem %s1035_s0, %s713_s18  ;;  %s982_s25 = scalar_lea.vmem %s1036_s1, %s715_s22 }
   0xf   : > { %262 = sbr.rel (%p716_p6) target bundleno = 22 (0x16), region = 36 }
  0x14   : > { %v931_v0 = vmov 0.0  }
  0x15   : > { %263 = vst [vmem:[#allocation2] sm:$0xff] %v931_v0 }
  0x16 PF: > { %v856_v1 = vld [vmem:[%s982_s25 + $0x38] sm:$0xff]  ;;  %v855_v5 = vld [vmem:[%s982_s25 + $0x30] sm:$0xff]  ;;  %v854_v9 = vld [vmem:[%s982_s25 + $0x28] sm:$0xff]  ;;  %p845_p7 = scmp.ne.s32.totalorder %s921_s12, 3 }
  0x17   : > { %v864_v2 = vld [vmem:[%s982_s25 + $0x78] sm:$0xff]  ;;  %537 = vmatpush.bf16.msra.mxu0 %v856_v1  ;;  %v863_v6 = vld [vmem:[%s982_s25 + $0x70] sm:$0xff]  ;;  %v862_v10 = vld [vmem:[%s982_s25 + $0x68] sm:$0xff] }
  0x18   : > { %v872_v3 = vld [vmem:[%s982_s25 + $0xb8] sm:$0xff]  ;;  %550 = vmatpush.bf16.msra.mxu1 %v864_v2  ;;  %v871_v7 = vld [vmem:[%s982_s25 + $0xb0] sm:$0xff]  ;;  %v870_v11 = vld [vmem:[%s982_s25 + $0xa8] sm:$0xff] }
  0x19   : > { %v880_v4 = vld [vmem:[%s982_s25 + $0xf8] sm:$0xff]  ;;  %563 = vmatpush.bf16.msra.mxu2 %v872_v3  ;;  %v879_v8 = vld [vmem:[%s982_s25 + $0xf0] sm:$0xff]  ;;  %v878_v12 = vld [vmem:[%s982_s25 + $0xe8] sm:$0xff] }
  0x1a   : > { %576 = vmatpush.bf16.msra.mxu3 %v880_v4  ;;  %v853_v13 = vld [vmem:[%s982_s25 + $0x20] sm:$0xff]  ;;  %v852_v17 = vld [vmem:[%s982_s25 + $0x18] sm:$0xff]  ;;  %v851_v21 = vld [vmem:[%s982_s25 + $0x10] sm:$0xff] }
  0x1b   : > { %538 = vmatpush.bf16.msra.mxu0 %v855_v5  ;;  %v861_v14 = vld [vmem:[%s982_s25 + $0x60] sm:$0xff]  ;;  %v860_v18 = vld [vmem:[%s982_s25 + $0x58] sm:$0xff]  ;;  %v859_v22 = vld [vmem:[%s982_s25 + $0x50] sm:$0xff] }
  0x1c   : > { %551 = vmatpush.bf16.msra.mxu1 %v863_v6  ;;  %v869_v15 = vld [vmem:[%s982_s25 + $0xa0] sm:$0xff]  ;;  %v868_v19 = vld [vmem:[%s982_s25 + $0x98] sm:$0xff]  ;;  %v867_v23 = vld [vmem:[%s982_s25 + $0x90] sm:$0xff] }
  0x1d   : > { %564 = vmatpush.bf16.msra.mxu2 %v871_v7  ;;  %v877_v16 = vld [vmem:[%s982_s25 + $0xe0] sm:$0xff]  ;;  %v876_v20 = vld [vmem:[%s982_s25 + $0xd8] sm:$0xff]  ;;  %v875_v24 = vld [vmem:[%s982_s25 + $0xd0] sm:$0xff] }
  0x1e   : > { %577 = vmatpush.bf16.msra.mxu3 %v879_v8  ;;  %v850_v25 = vld [vmem:[%s982_s25 + $0x8] sm:$0xff]  ;;  %v265_v27 = vld [vmem:[%s977_s21] sm:$0xff] }
  0x1f   : > { %539 = vmatpush.bf16.msra.mxu0 %v854_v9  ;;  %v858_v26 = vld [vmem:[%s982_s25 + $0x48] sm:$0xff]  ;;  %v333_v31 = vunpack.c.l.b16 %v265_v27  ;;  %v334_v32 = vunpack.c.h.b16 %v265_v27  ;;  %v849_v33 = vld [vmem:[%s982_s25] sm:$0xff] }
  0x20   : > { %552 = vmatpush.bf16.msra.mxu1 %v862_v10  ;;  %v866_v28 = vld [vmem:[%s982_s25 + $0x88] sm:$0xff]  ;;  %v857_v34 = vld [vmem:[%s982_s25 + $0x40] sm:$0xff] }
  0x21   : > { %565 = vmatpush.bf16.msra.mxu2 %v870_v11  ;;  %v874_v29 = vld [vmem:[%s982_s25 + $0xc8] sm:$0xff]  ;;  %v865_v37 = vld [vmem:[%s982_s25 + $0x80] sm:$0xff]  ;;  %v337_v39 = vpack.c.b16 %v333_v31, %v333_v31  ;;  %v338_v40 = vpack.c.b16 %v334_v32, %v334_v32 }
  0x22   : > { %578 = vmatpush.bf16.msra.mxu3 %v878_v12  ;;  %v266_v30 = vld [vmem:[%s977_s21 + $0x8] sm:$0xff]  ;;  %v873_v38 = vld [vmem:[%s982_s25 + $0xc0] sm:$0xff] }
  0x23   : > { %540 = vmatpush.bf16.msra.mxu0 %v853_v13  ;;  %v335_v35 = vunpack.c.l.b16 %v266_v30  ;;  %v336_v36 = vunpack.c.h.b16 %v266_v30  ;;  %v264_v51 = vld [vmem:[#allocation2] sm:$0xff] }
  0x24   : > { %553 = vmatpush.bf16.msra.mxu1 %v861_v14 }
  0x25   : > { %566 = vmatpush.bf16.msra.mxu2 %v869_v15  ;;  %v339_v41 = vpack.c.b16 %v335_v35, %v335_v35  ;;  %v340_v42 = vpack.c.b16 %v336_v36, %v336_v36 }
  0x26   : > { %579 = vmatpush.bf16.msra.mxu3 %v877_v16 }
  0x27   : > { %541 = vmatpush.bf16.msra.mxu0 %v852_v17 }
  0x28   : > { %554 = vmatpush.bf16.msra.mxu1 %v860_v18 }
  0x29   : > { %567 = vmatpush.bf16.msra.mxu2 %v868_v19 }
  0x2a   : > { %580 = vmatpush.bf16.msra.mxu3 %v876_v20 }
  0x2b   : > { %542 = vmatpush.bf16.msra.mxu0 %v851_v21 }
  0x2c   : > { %555 = vmatpush.bf16.msra.mxu1 %v859_v22 }
  0x2d   : > { %568 = vmatpush.bf16.msra.mxu2 %v867_v23 }
  0x2e   : > { %581 = vmatpush.bf16.msra.mxu3 %v875_v24 }
  0x2f   : > { %543 = vmatpush.bf16.msra.mxu0 %v850_v25 }
  0x30   : > { %556 = vmatpush.bf16.msra.mxu1 %v858_v26 }
  0x31   : > { %569 = vmatpush.bf16.msra.mxu2 %v866_v28 }
  0x32   : > { %582 = vmatpush.bf16.msra.mxu3 %v874_v29 }
  0x33   : > { %544 = vmatpush.bf16.msra.mxu0 %v849_v33 }
  0x34   : > { %557 = vmatpush.bf16.msra.mxu1 %v857_v34 }
  0x35   : > { %570 = vmatpush.bf16.msra.mxu2 %v865_v37 }
  0x36   : > { %583 = vmatpush.bf16.msra.mxu3 %v873_v38  ;;  %545 = vmatmul.bf16.vlgmr.msra.gmra.mxu0 %v337_v39 }
  0x37   : > { %558 = vmatmul.bf16.vlgmr.msra.gmra.mxu1 %v338_v40 }
  0x38   : > { %571 = vmatmul.bf16.vlgmr.msra.gmra.mxu2 %v339_v41 }
  0x39   : > { %584 = vmatmul.bf16.vlgmr.msra.gmra.mxu3 %v340_v42 }
  0xb3   : > { %v546_v43 = vpop.f32.mrf.mxu0 }
  0xb4   : > { %v559_v44 = vpop.f32.mrf.mxu1 }
  0xb5   : > { %v560_v45 = vadd.f32 %v559_v44, %v546_v43 }
  0xbb   : > { %v572_v46 = vpop.f32.mrf.mxu2  ;;  %v548_v49 = vpop.f32.mrf.mxu0 }
  0xbc   : > { %v585_v47 = vpop.f32.mrf.mxu3  ;;  %v573_v48 = vadd.f32 %v572_v46, %v560_v45  ;;  %v561_v50 = vpop.f32.mrf.mxu1 }
  0xbe   : > { %v586_v52 = vadd.f32 %v585_v47, %v573_v48 }
  0xc0   : > { %v589_v53 = vadd.f32 %v586_v52, %v264_v51  ;;  %594 = sbr.rel (%p845_p7) target bundleno = 205 (0xcd), region = 40 }
  0xc2   : > { %590 = vst [vmem:[#allocation2] sm:$0xff] %v589_v53 }
  0xc3   : > { %v574_v54 = vpop.f32.mrf.mxu2 }
  0xc4   : > { %v587_v55 = vpop.f32.mrf.mxu3 }
  0xc5   : > { %v906_v57 = vld [vmem:[%s1037_s2] ss:$0 sm:$0xff] }
  0xc9   : > { %v595_v56 = vld [vmem:[#allocation2] sm:$0xff] }
  0xca   : > { %v600_v58 = vadd.f32 %v906_v57, %v595_v56 }
  0xcc   : > { %601 = vst [vmem:[%s1038_s3] sm:$0xff] %v600_v58 }
  0xcd PF: > { %s13_s14 = sadd.s32 1, %s929_s14   ;;  %s1039_s12 = smov %s925_s13 }
  0xce   : > { %p10_p8 = scmp.ge.s32.totalorder %s13_s14, 6   ;;  %s1040_s13 = smov %s1042_s15 }
  0xd0   :  { %12 = sbr.rel (!%p10_p8) target bundleno = 2 (0x2), region = 76 }

</bundles_post_ra>
